<compile_context>
chip_gen: v7x
topology: tpu7x:2x2x1
jax: 0.10.0
libtpu: 0.0.40
codegen_flags: <defaults>
</compile_context>

<pallas_src>
import functools

import jax
import jax.numpy as jnp
from jax import lax
from jax.experimental import pallas as pl
from jax.experimental.pallas import tpu as pltpu


def _down_double_conv_kernel(x_ref, w1_ref, w2_ref, gb_ref, out_ref,
                             xpad1_ref, xpad2_ref, act_ref,
                             *, Hp, Wp, Cin, C1, eps, slab_h):
    """One batch element of double_conv on the (already max-pooled) NHWC tile.

    x_ref     : (1, Hp, Wp, Cin)          pooled input tile (model dtype)
    w1_ref    : (9*Cin, C1)   cdtype      conv1 im2col weights, rows ordered (dy, dx, ci)
    w2_ref    : (9*C1, C1)    cdtype      conv2 im2col weights
    gb_ref    : (4, C1)       f32         rows = [gamma1, beta1, gamma2, beta2]
    out_ref   : (1, C1, Hp*Wp)            channel-first, spatially flattened output
    xpad1_ref : (Hp+2, Wp+2, Cin) cdtype  zero-padded pooled input (scratch)
    xpad2_ref : (Hp+2, Wp+2, C1)  cdtype  zero-padded conv1 activation (scratch)
    act_ref   : (Hp*Wp, C1)   f32         pre-norm activation, reused by both layers
    """
    cdtype = xpad1_ref.dtype
    n_slabs = Hp // slab_h
    slab_rows = slab_h * Wp
    inv_hw = 1.0 / float(Hp * Wp)

    # Zero only the 1-element border (4 thin strips); the interior is fully overwritten
    # every grid step, so no full-buffer fill is needed.
    def zero_border(ref):
        h2, w2, c = ref.shape
        ref[0:1, :, :] = jnp.zeros((1, w2, c), ref.dtype)
        ref[h2 - 1:h2, :, :] = jnp.zeros((1, w2, c), ref.dtype)
        ref[:, 0:1, :] = jnp.zeros((h2, 1, c), ref.dtype)
        ref[:, w2 - 1:w2, :] = jnp.zeros((h2, 1, c), ref.dtype)

    zero_border(xpad1_ref)
    zero_border(xpad2_ref)

    # Pooled input -> padded interior (single cast+copy; border stays zero).
    xpad1_ref[1:Hp + 1, 1:Wp + 1, :] = x_ref[0].astype(cdtype)

    def conv_pass(xpad_ref, w_ref, c_in):
        """H-slab-tiled im2col conv3x3: fills act_ref, returns per-channel (sum, sumsq)."""
        w = w_ref[...]                                        # hoisted weight load
        acc_s = jnp.zeros((1, C1), jnp.float32)
        acc_q = jnp.zeros((1, C1), jnp.float32)
        for s in range(n_slabs):                              # fully unrolled, static indices
            h0 = s * slab_h
            # Hoist the three dx-shifted (sublane-misaligned) slabs once per slab and
            # reuse them across the three dy taps (3 misaligned reads instead of 9).
            xdx = [xpad_ref[h0:h0 + slab_h + 2, dx:dx + Wp, :] for dx in range(3)]
            taps = [xdx[dx][dy:dy + slab_h] for dy in range(3) for dx in range(3)]
            p = jnp.concatenate(taps, axis=-1).reshape(slab_rows, 9 * c_in)
            # One big-K MXU matmul per slab (K = 9*c_in), f32 accumulation.
            a = jnp.dot(p, w, preferred_element_type=jnp.float32)   # (slab_rows, C1)
            act_ref[s * slab_rows:(s + 1) * slab_rows, :] = a
            acc_s = acc_s + jnp.sum(a, axis=0, keepdims=True)
            acc_q = acc_q + jnp.sum(a * a, axis=0, keepdims=True)
        return acc_s, acc_q

    def fold_norm(acc_s, acc_q, g, b):
        """InstanceNorm2d(affine) folded into one per-channel scale/shift."""
        mean = acc_s * inv_hw
        var = jnp.maximum(acc_q * inv_hw - mean * mean, 0.0)  # clamp one-pass variance
        scale = lax.rsqrt(var + eps) * g                      # rsqrt -> EUP slot
        shift = b - mean * scale
        return scale, shift

    # ---------------- layer 1: conv -> IN -> ReLU (stays in VMEM) ----------------
    s1, q1 = conv_pass(xpad1_ref, w1_ref, Cin)
    scale1, shift1 = fold_norm(s1, q1, gb_ref[0:1, :], gb_ref[1:2, :])
    for s in range(n_slabs):
        a = act_ref[s * slab_rows:(s + 1) * slab_rows, :]
        y = jnp.maximum(a * scale1 + shift1, 0.0).astype(cdtype)
        xpad2_ref[1 + s * slab_h:1 + (s + 1) * slab_h, 1:Wp + 1, :] = (
            y.reshape(slab_h, Wp, C1))

    # ---------------- layer 2: conv -> IN -> ReLU -> store ----------------
    s2, q2 = conv_pass(xpad2_ref, w2_ref, C1)
    scale2, shift2 = fold_norm(s2, q2, gb_ref[2:3, :], gb_ref[3:4, :])
    for s in range(n_slabs):
        a = act_ref[s * slab_rows:(s + 1) * slab_rows, :]
        y = jnp.maximum(a * scale2 + shift2, 0.0)
        # Per-slab transpose (small XLU work) -> channel-first store so the wrapper gets
        # NCHW with a free contiguous reshape (no HBM transpose pass).
        out_ref[0, :, s * slab_rows:(s + 1) * slab_rows] = (
            jnp.transpose(y).astype(out_ref.dtype))


def down_forward(x_nchw, params, *, eps=1e-5, mxu_dtype=jnp.bfloat16):
    """PyTorch-equivalent `down` forward: (N, Cin, H, W) -> (N, Cout, H//2, W//2)."""
    N, Cin, H, W = x_nchw.shape
    assert H % 2 == 0 and W % 2 == 0
    Hp, Wp = H // 2, W // 2
    C1 = params["w1_mat"].shape[-1]

    # MaxPool2d(2) fused with the NCHW->NHWC layout change into a single XLA pass over
    # the input, kept in the model dtype (no f32 upcast of the pooled intermediate).
    pooled = jnp.transpose(
        jnp.max(x_nchw.reshape(N, Cin, Hp, 2, Wp, 2), axis=(3, 5)), (0, 2, 3, 1))

    # H-slab size for the in-kernel im2col tiling (8-16 output rows per matmul).
    slab_h = next(s for s in (16, 8, 4, 2, 1) if Hp % s == 0)

    # Pack the four InstanceNorm affine vectors into a single (4, C1) operand.
    gb = jnp.stack([params["g1"], params["b1"], params["g2"], params["b2"]],
                   axis=0).astype(jnp.float32)

    kernel = functools.partial(_down_double_conv_kernel, Hp=Hp, Wp=Wp, Cin=Cin,
                               C1=C1, eps=eps, slab_h=slab_h)
    out_flat = pl.pallas_call(
        kernel,
        out_shape=jax.ShapeDtypeStruct((N, C1, Hp * Wp), x_nchw.dtype),
        grid=(N,),
        in_specs=[
            pl.BlockSpec((1, Hp, Wp, Cin), lambda n: (n, 0, 0, 0)),
            pl.BlockSpec((9 * Cin, C1), lambda n: (0, 0)),
            pl.BlockSpec((9 * C1, C1), lambda n: (0, 0)),
            pl.BlockSpec((4, C1), lambda n: (0, 0)),
        ],
        out_specs=pl.BlockSpec((1, C1, Hp * Wp), lambda n: (n, 0, 0)),
        scratch_shapes=[
            pltpu.VMEM((Hp + 2, Wp + 2, Cin), mxu_dtype),   # padded pooled input
            pltpu.VMEM((Hp + 2, Wp + 2, C1), mxu_dtype),    # padded conv1 activation
            pltpu.VMEM((Hp * Wp, C1), jnp.float32),         # pre-norm act (both layers)
        ],
        compiler_params=pltpu.CompilerParams(
            dimension_semantics=("parallel",),
            vmem_limit_bytes=48 * 1024 * 1024),
    )(pooled,
      params["w1_mat"].astype(mxu_dtype),
      params["w2_mat"].astype(mxu_dtype),
      gb)

    # (N, C1, Hp*Wp) -> (N, C1, Hp, Wp): contiguous, metadata-only reshape.
    return out_flat.reshape(N, C1, Hp, Wp)


def init_params(key, in_ch, out_ch):
    k1, k2, k3, k4 = jax.random.split(key, 4)
    # PyTorch conv weight layout is OIHW; keep it for the reference, plus pre-reshaped
    # im2col weight matrices (rows ordered (dy, dx, ci)) for the kernel.
    w1_oihw = jax.random.normal(k1, (out_ch, in_ch, 3, 3), jnp.float32) * 0.1
    w2_oihw = jax.random.normal(k2, (out_ch, out_ch, 3, 3), jnp.float32) * 0.1

    def to_mat(w_oihw):
        cout = w_oihw.shape[0]
        return jnp.transpose(w_oihw, (2, 3, 1, 0)).reshape(-1, cout)   # (9*Cin, Cout)

    return {
        "w1_oihw": w1_oihw, "w2_oihw": w2_oihw,
        "w1_mat": to_mat(w1_oihw), "w2_mat": to_mat(w2_oihw),
        "g1": 1.0 + 0.1 * jax.random.normal(k3, (out_ch,), jnp.float32),
        "b1": 0.1 * jnp.arange(out_ch, dtype=jnp.float32),
        "g2": 1.0 + 0.1 * jax.random.normal(k4, (out_ch,), jnp.float32),
        "b2": -0.05 * jnp.arange(out_ch, dtype=jnp.float32),
    }


def _reference_forward(x_nchw, params, eps=1e-5):
    """Pure-JAX reference: maxpool(2) -> (conv3x3 -> InstanceNorm -> ReLU) * 2 in NCHW."""
    N, C, H, W = x_nchw.shape
    x = jnp.max(x_nchw.reshape(N, C, H // 2, 2, W // 2, 2), axis=(3, 5))

    def block(x, w_oihw, g, b):
        y = lax.conv_general_dilated(
            x, w_oihw, window_strides=(1, 1), padding=((1, 1), (1, 1)),
            dimension_numbers=("NCHW", "OIHW", "NCHW"))
        mean = jnp.mean(y, axis=(2, 3), keepdims=True)
        var = jnp.mean((y - mean) ** 2, axis=(2, 3), keepdims=True)
        y = (y - mean) * lax.rsqrt(var + eps)
        y = y * g.reshape(1, -1, 1, 1) + b.reshape(1, -1, 1, 1)
        return jnp.maximum(y, 0.0)

    x = block(x, params["w1_oihw"], params["g1"], params["b1"])
    x = block(x, params["w2_oihw"], params["g2"], params["b2"])
    return x


if __name__ == "__main__":
    N, IN_CH, OUT_CH, H, W = 2, 4, 8, 16, 16
    key = jax.random.PRNGKey(0)
    kx, kp = jax.random.split(key)
    x = jax.random.normal(kx, (N, IN_CH, H, W), jnp.float32)
    params = init_params(kp, IN_CH, OUT_CH)

    ref = _reference_forward(x, params)

    # f32-operand path: tight structural / numerical check of the fused kernel.
    out_f32 = jax.block_until_ready(down_forward(x, params, mxu_dtype=jnp.float32))
    assert out_f32.shape == (N, OUT_CH, H // 2, W // 2)
    assert jnp.allclose(out_f32, ref, atol=2e-3, rtol=2e-3), "f32 path mismatch vs ref"

    # bf16 MXU-operand path (the performance configuration): looser tolerance.
    out_bf16 = jax.block_until_ready(down_forward(x, params))
    assert out_bf16.shape == (N, OUT_CH, H // 2, W // 2)
    assert jnp.allclose(out_bf16, ref, atol=5e-2, rtol=5e-2), "bf16 path mismatch vs ref"

    print("KERNEL_OK")
</pallas_src>

<mosaic_0001>
module attributes {stable_mosaic.version = 11 : i64} {
  func.func @_down_double_conv_kernel(%arg0: i32, %arg1: memref<1x8x8x4xf32, #tpu.memory_space<vmem>>, %arg2: memref<36x8xf32, #tpu.memory_space<vmem>>, %arg3: memref<72x8xf32, #tpu.memory_space<vmem>>, %arg4: memref<4x8xf32, #tpu.memory_space<vmem>>, %arg5: memref<1x8x64xf32, #tpu.memory_space<vmem>>, %arg6: memref<10x10x4xf32, #tpu.memory_space<vmem>>, %arg7: memref<10x10x8xf32, #tpu.memory_space<vmem>>, %arg8: memref<64x8xf32, #tpu.memory_space<vmem>>) attributes {dimension_semantics = [#tpu.dimension_semantics<parallel>], iteration_bounds = array<i64: 2>, scalar_prefetch = 0 : i64, scratch_operands = 3 : i64, tpu.core_type = #tpu.core_type<tc>, window_params = [{transform_indices = @transform_0, window_bounds = array<i64: 1, 8, 8, 4>}, {pipeline_mode = #tpu.pipeline_mode<synchronous>, transform_indices = @transform_1, window_bounds = array<i64: 36, 8>}, {pipeline_mode = #tpu.pipeline_mode<synchronous>, transform_indices = @transform_2, window_bounds = array<i64: 72, 8>}, {pipeline_mode = #tpu.pipeline_mode<synchronous>, transform_indices = @transform_3, window_bounds = array<i64: 4, 8>}, {transform_indices = @transform_4, window_bounds = array<i64: 1, 8, 64>}]} {
    %cst = arith.constant 0.000000e+00 : f32
    %0 = vector.broadcast %cst : f32 to vector<1x10x4xf32>
    %c0 = arith.constant 0 : index
    %c0_0 = arith.constant 0 : index
    %c0_1 = arith.constant 0 : index
    %1 = vector.load %arg6[%c0, %c0_0, %c0_1] : memref<10x10x4xf32, #tpu.memory_space<vmem>>, vector<1x10x4xf32>
    tpu.vector_store %arg6[%c0, %c0_0, %c0_1], %0 {strides = array<i32>} : memref<10x10x4xf32, #tpu.memory_space<vmem>>, vector<1x10x4xf32>,
    %cst_2 = arith.constant 0.000000e+00 : f32
    %2 = vector.broadcast %cst_2 : f32 to vector<1x10x4xf32>
    %c9 = arith.constant 9 : index
    %c0_3 = arith.constant 0 : index
    %c0_4 = arith.constant 0 : index
    %3 = vector.load %arg6[%c9, %c0_3, %c0_4] : memref<10x10x4xf32, #tpu.memory_space<vmem>>, vector<1x10x4xf32>
    tpu.vector_store %arg6[%c9, %c0_3, %c0_4], %2 {strides = array<i32>} : memref<10x10x4xf32, #tpu.memory_space<vmem>>, vector<1x10x4xf32>,
    %cst_5 = arith.constant 0.000000e+00 : f32
    %4 = vector.broadcast %cst_5 : f32 to vector<10x1x4xf32>
    %c0_6 = arith.constant 0 : index
    %c0_7 = arith.constant 0 : index
    %c0_8 = arith.constant 0 : index
    %5 = vector.load %arg6[%c0_6, %c0_7, %c0_8] : memref<10x10x4xf32, #tpu.memory_space<vmem>>, vector<10x1x4xf32>
    tpu.vector_store %arg6[%c0_6, %c0_7, %c0_8], %4 {strides = array<i32>} : memref<10x10x4xf32, #tpu.memory_space<vmem>>, vector<10x1x4xf32>,
    %cst_9 = arith.constant 0.000000e+00 : f32
    %6 = vector.broadcast %cst_9 : f32 to vector<10x1x4xf32>
    %c0_10 = arith.constant 0 : index
    %c9_11 = arith.constant 9 : index
    %c0_12 = arith.constant 0 : index
    %7 = vector.load %arg6[%c0_10, %c9_11, %c0_12] : memref<10x10x4xf32, #tpu.memory_space<vmem>>, vector<10x1x4xf32>
    tpu.vector_store %arg6[%c0_10, %c9_11, %c0_12], %6 {strides = array<i32>} : memref<10x10x4xf32, #tpu.memory_space<vmem>>, vector<10x1x4xf32>,
    %cst_13 = arith.constant 0.000000e+00 : f32
    %8 = vector.broadcast %cst_13 : f32 to vector<1x10x8xf32>
    %c0_14 = arith.constant 0 : index
    %c0_15 = arith.constant 0 : index
    %c0_16 = arith.constant 0 : index
    %9 = vector.load %arg7[%c0_14, %c0_15, %c0_16] : memref<10x10x8xf32, #tpu.memory_space<vmem>>, vector<1x10x8xf32>
    tpu.vector_store %arg7[%c0_14, %c0_15, %c0_16], %8 {strides = array<i32>} : memref<10x10x8xf32, #tpu.memory_space<vmem>>, vector<1x10x8xf32>,
    %cst_17 = arith.constant 0.000000e+00 : f32
    %10 = vector.broadcast %cst_17 : f32 to vector<1x10x8xf32>
    %c9_18 = arith.constant 9 : index
    %c0_19 = arith.constant 0 : index
    %c0_20 = arith.constant 0 : index
    %11 = vector.load %arg7[%c9_18, %c0_19, %c0_20] : memref<10x10x8xf32, #tpu.memory_space<vmem>>, vector<1x10x8xf32>
    tpu.vector_store %arg7[%c9_18, %c0_19, %c0_20], %10 {strides = array<i32>} : memref<10x10x8xf32, #tpu.memory_space<vmem>>, vector<1x10x8xf32>,
    %cst_21 = arith.constant 0.000000e+00 : f32
    %12 = vector.broadcast %cst_21 : f32 to vector<10x1x8xf32>
    %c0_22 = arith.constant 0 : index
    %c0_23 = arith.constant 0 : index
    %c0_24 = arith.constant 0 : index
    %13 = vector.load %arg7[%c0_22, %c0_23, %c0_24] : memref<10x10x8xf32, #tpu.memory_space<vmem>>, vector<10x1x8xf32>
    tpu.vector_store %arg7[%c0_22, %c0_23, %c0_24], %12 {strides = array<i32>} : memref<10x10x8xf32, #tpu.memory_space<vmem>>, vector<10x1x8xf32>,
    %cst_25 = arith.constant 0.000000e+00 : f32
    %14 = vector.broadcast %cst_25 : f32 to vector<10x1x8xf32>
    %c0_26 = arith.constant 0 : index
    %c9_27 = arith.constant 9 : index
    %c0_28 = arith.constant 0 : index
    %15 = vector.load %arg7[%c0_26, %c9_27, %c0_28] : memref<10x10x8xf32, #tpu.memory_space<vmem>>, vector<10x1x8xf32>
    tpu.vector_store %arg7[%c0_26, %c9_27, %c0_28], %14 {strides = array<i32>} : memref<10x10x8xf32, #tpu.memory_space<vmem>>, vector<10x1x8xf32>,
    %c0_29 = arith.constant 0 : index
    %c0_30 = arith.constant 0 : index
    %c0_31 = arith.constant 0 : index
    %c0_32 = arith.constant 0 : index
    %16 = vector.load %arg1[%c0_29, %c0_30, %c0_31, %c0_32] : memref<1x8x8x4xf32, #tpu.memory_space<vmem>>, vector<1x8x8x4xf32>
    %17 = vector.shape_cast %16 : vector<1x8x8x4xf32> to vector<8x8x4xf32>
    %c1 = arith.constant 1 : index
    %c1_33 = arith.constant 1 : index
    %c0_34 = arith.constant 0 : index
    %18 = vector.load %arg6[%c1, %c1_33, %c0_34] : memref<10x10x4xf32, #tpu.memory_space<vmem>>, vector<8x8x4xf32>
    tpu.vector_store %arg6[%c1, %c1_33, %c0_34], %17 {strides = array<i32>} : memref<10x10x4xf32, #tpu.memory_space<vmem>>, vector<8x8x4xf32>,
    %c0_35 = arith.constant 0 : index
    %c0_36 = arith.constant 0 : index
    %19 = vector.load %arg2[%c0_35, %c0_36] : memref<36x8xf32, #tpu.memory_space<vmem>>, vector<36x8xf32>
    %cst_37 = arith.constant 0.000000e+00 : f32
    %20 = vector.broadcast %cst_37 : f32 to vector<1x8xf32>
    %cst_38 = arith.constant 0.000000e+00 : f32
    %21 = vector.broadcast %cst_38 : f32 to vector<1x8xf32>
    %c0_39 = arith.constant 0 : index
    %c0_40 = arith.constant 0 : index
    %c0_41 = arith.constant 0 : index
    %22 = vector.load %arg6[%c0_39, %c0_40, %c0_41] : memref<10x10x4xf32, #tpu.memory_space<vmem>>, vector<10x8x4xf32>
    %c0_42 = arith.constant 0 : index
    %c1_43 = arith.constant 1 : index
    %c0_44 = arith.constant 0 : index
    %23 = vector.load %arg6[%c0_42, %c1_43, %c0_44] : memref<10x10x4xf32, #tpu.memory_space<vmem>>, vector<10x8x4xf32>
    %c0_45 = arith.constant 0 : index
    %c2 = arith.constant 2 : index
    %c0_46 = arith.constant 0 : index
    %24 = vector.load %arg6[%c0_45, %c2, %c0_46] : memref<10x10x4xf32, #tpu.memory_space<vmem>>, vector<10x8x4xf32>
    %25 = vector.extract_strided_slice %22 {offsets = [0, 0, 0], sizes = [8, 8, 4], strides = [1, 1, 1]} : vector<10x8x4xf32> to vector<8x8x4xf32>
    %26 = vector.extract_strided_slice %23 {offsets = [0, 0, 0], sizes = [8, 8, 4], strides = [1, 1, 1]} : vector<10x8x4xf32> to vector<8x8x4xf32>
    %27 = vector.extract_strided_slice %24 {offsets = [0, 0, 0], sizes = [8, 8, 4], strides = [1, 1, 1]} : vector<10x8x4xf32> to vector<8x8x4xf32>
    %28 = vector.extract_strided_slice %22 {offsets = [1, 0, 0], sizes = [8, 8, 4], strides = [1, 1, 1]} : vector<10x8x4xf32> to vector<8x8x4xf32>
    %29 = vector.extract_strided_slice %23 {offsets = [1, 0, 0], sizes = [8, 8, 4], strides = [1, 1, 1]} : vector<10x8x4xf32> to vector<8x8x4xf32>
    %30 = vector.extract_strided_slice %24 {offsets = [1, 0, 0], sizes = [8, 8, 4], strides = [1, 1, 1]} : vector<10x8x4xf32> to vector<8x8x4xf32>
    %31 = vector.extract_strided_slice %22 {offsets = [2, 0, 0], sizes = [8, 8, 4], strides = [1, 1, 1]} : vector<10x8x4xf32> to vector<8x8x4xf32>
    %32 = vector.extract_strided_slice %23 {offsets = [2, 0, 0], sizes = [8, 8, 4], strides = [1, 1, 1]} : vector<10x8x4xf32> to vector<8x8x4xf32>
    %33 = vector.extract_strided_slice %24 {offsets = [2, 0, 0], sizes = [8, 8, 4], strides = [1, 1, 1]} : vector<10x8x4xf32> to vector<8x8x4xf32>
    %34 = tpu.concatenate %25, %26, %27, %28, %29, %30, %31, %32, %33 in 2 : vector<8x8x4xf32>, vector<8x8x4xf32>, vector<8x8x4xf32>, vector<8x8x4xf32>, vector<8x8x4xf32>, vector<8x8x4xf32>, vector<8x8x4xf32>, vector<8x8x4xf32>, vector<8x8x4xf32> -> vector<8x8x36xf32>
    %35 = vector.shape_cast %34 : vector<8x8x36xf32> to vector<64x36xf32>
    %cst_47 = arith.constant dense<0.000000e+00> : vector<64x8xf32>
    %36 = tpu.matmul %35, %19, %cst_47 {dimension_numbers = #tpu.dot_dimension_numbers<[1], [0], [0], [1], [0, 0, 1, 1], [], []>} : vector<64x36xf32>, vector<36x8xf32>, vector<64x8xf32> -> vector<64x8xf32>
    %c0_48 = arith.constant 0 : index
    %c0_49 = arith.constant 0 : index
    %37 = vector.load %arg8[%c0_48, %c0_49] : memref<64x8xf32, #tpu.memory_space<vmem>>, vector<64x8xf32>
    tpu.vector_store %arg8[%c0_48, %c0_49], %36 {strides = array<i32>} : memref<64x8xf32, #tpu.memory_space<vmem>>, vector<64x8xf32>,
    %cst_50 = arith.constant dense<0.000000e+00> : vector<8xf32>
    %38 = vector.multi_reduction <add>, %36, %cst_50 [0] : vector<64x8xf32> to vector<8xf32>
    %39 = vector.shape_cast %38 : vector<8xf32> to vector<1x8xf32>
    %40 = arith.addf %20, %39 : vector<1x8xf32>
    %41 = arith.mulf %36, %36 : vector<64x8xf32>
    %cst_51 = arith.constant dense<0.000000e+00> : vector<8xf32>
    %42 = vector.multi_reduction <add>, %41, %cst_51 [0] : vector<64x8xf32> to vector<8xf32>
    %43 = vector.shape_cast %42 : vector<8xf32> to vector<1x8xf32>
    %44 = arith.addf %21, %43 : vector<1x8xf32>
    %c0_52 = arith.constant 0 : index
    %c0_53 = arith.constant 0 : index
    %45 = vector.load %arg4[%c0_52, %c0_53] : memref<4x8xf32, #tpu.memory_space<vmem>>, vector<1x8xf32>
    %c1_54 = arith.constant 1 : index
    %c0_55 = arith.constant 0 : index
    %46 = vector.load %arg4[%c1_54, %c0_55] : memref<4x8xf32, #tpu.memory_space<vmem>>, vector<1x8xf32>
    %cst_56 = arith.constant 1.562500e-02 : f32
    %47 = vector.broadcast %cst_56 : f32 to vector<1x8xf32>
    %48 = arith.mulf %40, %47 : vector<1x8xf32>
    %cst_57 = arith.constant 1.562500e-02 : f32
    %49 = vector.broadcast %cst_57 : f32 to vector<1x8xf32>
    %50 = arith.mulf %44, %49 : vector<1x8xf32>
    %51 = arith.mulf %48, %48 : vector<1x8xf32>
    %52 = arith.subf %50, %51 : vector<1x8xf32>
    %cst_58 = arith.constant 0.000000e+00 : f32
    %53 = vector.broadcast %cst_58 : f32 to vector<1x8xf32>
    %54 = arith.maximumf %52, %53 : vector<1x8xf32>
    %cst_59 = arith.constant 9.99999974E-6 : f32
    %55 = vector.broadcast %cst_59 : f32 to vector<1x8xf32>
    %56 = arith.addf %54, %55 : vector<1x8xf32>
    %57 = math.rsqrt %56 : vector<1x8xf32>
    %58 = arith.mulf %57, %45 : vector<1x8xf32>
    %59 = arith.mulf %48, %58 : vector<1x8xf32>
    %60 = arith.subf %46, %59 : vector<1x8xf32>
    %c0_60 = arith.constant 0 : index
    %c0_61 = arith.constant 0 : index
    %61 = vector.load %arg8[%c0_60, %c0_61] : memref<64x8xf32, #tpu.memory_space<vmem>>, vector<64x8xf32>
    %62 = vector.broadcast %58 : vector<1x8xf32> to vector<64x8xf32>
    %63 = arith.mulf %61, %62 : vector<64x8xf32>
    %64 = vector.broadcast %60 : vector<1x8xf32> to vector<64x8xf32>
    %65 = arith.addf %63, %64 : vector<64x8xf32>
    %cst_62 = arith.constant 0.000000e+00 : f32
    %66 = vector.broadcast %cst_62 : f32 to vector<64x8xf32>
    %67 = arith.maximumf %65, %66 : vector<64x8xf32>
    %68 = vector.shape_cast %67 : vector<64x8xf32> to vector<8x8x8xf32>
    %c1_63 = arith.constant 1 : index
    %c1_64 = arith.constant 1 : index
    %c0_65 = arith.constant 0 : index
    %69 = vector.load %arg7[%c1_63, %c1_64, %c0_65] : memref<10x10x8xf32, #tpu.memory_space<vmem>>, vector<8x8x8xf32>
    tpu.vector_store %arg7[%c1_63, %c1_64, %c0_65], %68 {strides = array<i32>} : memref<10x10x8xf32, #tpu.memory_space<vmem>>, vector<8x8x8xf32>,
    %c0_66 = arith.constant 0 : index
    %c0_67 = arith.constant 0 : index
    %70 = vector.load %arg3[%c0_66, %c0_67] : memref<72x8xf32, #tpu.memory_space<vmem>>, vector<72x8xf32>
    %cst_68 = arith.constant 0.000000e+00 : f32
    %71 = vector.broadcast %cst_68 : f32 to vector<1x8xf32>
    %cst_69 = arith.constant 0.000000e+00 : f32
    %72 = vector.broadcast %cst_69 : f32 to vector<1x8xf32>
    %c0_70 = arith.constant 0 : index
    %c0_71 = arith.constant 0 : index
    %c0_72 = arith.constant 0 : index
    %73 = vector.load %arg7[%c0_70, %c0_71, %c0_72] : memref<10x10x8xf32, #tpu.memory_space<vmem>>, vector<10x8x8xf32>
    %c0_73 = arith.constant 0 : index
    %c1_74 = arith.constant 1 : index
    %c0_75 = arith.constant 0 : index
    %74 = vector.load %arg7[%c0_73, %c1_74, %c0_75] : memref<10x10x8xf32, #tpu.memory_space<vmem>>, vector<10x8x8xf32>
    %c0_76 = arith.constant 0 : index
    %c2_77 = arith.constant 2 : index
    %c0_78 = arith.constant 0 : index
    %75 = vector.load %arg7[%c0_76, %c2_77, %c0_78] : memref<10x10x8xf32, #tpu.memory_space<vmem>>, vector<10x8x8xf32>
    %76 = vector.extract_strided_slice %73 {offsets = [0, 0, 0], sizes = [8, 8, 8], strides = [1, 1, 1]} : vector<10x8x8xf32> to vector<8x8x8xf32>
    %77 = vector.extract_strided_slice %74 {offsets = [0, 0, 0], sizes = [8, 8, 8], strides = [1, 1, 1]} : vector<10x8x8xf32> to vector<8x8x8xf32>
    %78 = vector.extract_strided_slice %75 {offsets = [0, 0, 0], sizes = [8, 8, 8], strides = [1, 1, 1]} : vector<10x8x8xf32> to vector<8x8x8xf32>
    %79 = vector.extract_strided_slice %73 {offsets = [1, 0, 0], sizes = [8, 8, 8], strides = [1, 1, 1]} : vector<10x8x8xf32> to vector<8x8x8xf32>
    %80 = vector.extract_strided_slice %74 {offsets = [1, 0, 0], sizes = [8, 8, 8], strides = [1, 1, 1]} : vector<10x8x8xf32> to vector<8x8x8xf32>
    %81 = vector.extract_strided_slice %75 {offsets = [1, 0, 0], sizes = [8, 8, 8], strides = [1, 1, 1]} : vector<10x8x8xf32> to vector<8x8x8xf32>
    %82 = vector.extract_strided_slice %73 {offsets = [2, 0, 0], sizes = [8, 8, 8], strides = [1, 1, 1]} : vector<10x8x8xf32> to vector<8x8x8xf32>
    %83 = vector.extract_strided_slice %74 {offsets = [2, 0, 0], sizes = [8, 8, 8], strides = [1, 1, 1]} : vector<10x8x8xf32> to vector<8x8x8xf32>
    %84 = vector.extract_strided_slice %75 {offsets = [2, 0, 0], sizes = [8, 8, 8], strides = [1, 1, 1]} : vector<10x8x8xf32> to vector<8x8x8xf32>
    %85 = tpu.concatenate %76, %77, %78, %79, %80, %81, %82, %83, %84 in 2 : vector<8x8x8xf32>, vector<8x8x8xf32>, vector<8x8x8xf32>, vector<8x8x8xf32>, vector<8x8x8xf32>, vector<8x8x8xf32>, vector<8x8x8xf32>, vector<8x8x8xf32>, vector<8x8x8xf32> -> vector<8x8x72xf32>
    %86 = vector.shape_cast %85 : vector<8x8x72xf32> to vector<64x72xf32>
    %cst_79 = arith.constant dense<0.000000e+00> : vector<64x8xf32>
    %87 = tpu.matmul %86, %70, %cst_79 {dimension_numbers = #tpu.dot_dimension_numbers<[1], [0], [0], [1], [0, 0, 1, 1], [], []>} : vector<64x72xf32>, vector<72x8xf32>, vector<64x8xf32> -> vector<64x8xf32>
    %c0_80 = arith.constant 0 : index
    %c0_81 = arith.constant 0 : index
    %88 = vector.load %arg8[%c0_80, %c0_81] : memref<64x8xf32, #tpu.memory_space<vmem>>, vector<64x8xf32>
    tpu.vector_store %arg8[%c0_80, %c0_81], %87 {strides = array<i32>} : memref<64x8xf32, #tpu.memory_space<vmem>>, vector<64x8xf32>,
    %cst_82 = arith.constant dense<0.000000e+00> : vector<8xf32>
    %89 = vector.multi_reduction <add>, %87, %cst_82 [0] : vector<64x8xf32> to vector<8xf32>
    %90 = vector.shape_cast %89 : vector<8xf32> to vector<1x8xf32>
    %91 = arith.addf %71, %90 : vector<1x8xf32>
    %92 = arith.mulf %87, %87 : vector<64x8xf32>
    %cst_83 = arith.constant dense<0.000000e+00> : vector<8xf32>
    %93 = vector.multi_reduction <add>, %92, %cst_83 [0] : vector<64x8xf32> to vector<8xf32>
    %94 = vector.shape_cast %93 : vector<8xf32> to vector<1x8xf32>
    %95 = arith.addf %72, %94 : vector<1x8xf32>
    %c2_84 = arith.constant 2 : index
    %c0_85 = arith.constant 0 : index
    %96 = vector.load %arg4[%c2_84, %c0_85] : memref<4x8xf32, #tpu.memory_space<vmem>>, vector<1x8xf32>
    %c3 = arith.constant 3 : index
    %c0_86 = arith.constant 0 : index
    %97 = vector.load %arg4[%c3, %c0_86] : memref<4x8xf32, #tpu.memory_space<vmem>>, vector<1x8xf32>
    %cst_87 = arith.constant 1.562500e-02 : f32
    %98 = vector.broadcast %cst_87 : f32 to vector<1x8xf32>
    %99 = arith.mulf %91, %98 : vector<1x8xf32>
    %cst_88 = arith.constant 1.562500e-02 : f32
    %100 = vector.broadcast %cst_88 : f32 to vector<1x8xf32>
    %101 = arith.mulf %95, %100 : vector<1x8xf32>
    %102 = arith.mulf %99, %99 : vector<1x8xf32>
    %103 = arith.subf %101, %102 : vector<1x8xf32>
    %cst_89 = arith.constant 0.000000e+00 : f32
    %104 = vector.broadcast %cst_89 : f32 to vector<1x8xf32>
    %105 = arith.maximumf %103, %104 : vector<1x8xf32>
    %cst_90 = arith.constant 9.99999974E-6 : f32
    %106 = vector.broadcast %cst_90 : f32 to vector<1x8xf32>
    %107 = arith.addf %105, %106 : vector<1x8xf32>
    %108 = math.rsqrt %107 : vector<1x8xf32>
    %109 = arith.mulf %108, %96 : vector<1x8xf32>
    %110 = arith.mulf %99, %109 : vector<1x8xf32>
    %111 = arith.subf %97, %110 : vector<1x8xf32>
    %c0_91 = arith.constant 0 : index
    %c0_92 = arith.constant 0 : index
    %112 = vector.load %arg8[%c0_91, %c0_92] : memref<64x8xf32, #tpu.memory_space<vmem>>, vector<64x8xf32>
    %113 = vector.broadcast %109 : vector<1x8xf32> to vector<64x8xf32>
    %114 = arith.mulf %112, %113 : vector<64x8xf32>
    %115 = vector.broadcast %111 : vector<1x8xf32> to vector<64x8xf32>
    %116 = arith.addf %114, %115 : vector<64x8xf32>
    %cst_93 = arith.constant 0.000000e+00 : f32
    %117 = vector.broadcast %cst_93 : f32 to vector<64x8xf32>
    %118 = arith.maximumf %116, %117 : vector<64x8xf32>
    %119 = tpu.transpose %118, [1, 0] : vector<64x8xf32> -> vector<8x64xf32>
    %c0_94 = arith.constant 0 : index
    %c0_95 = arith.constant 0 : index
    %c0_96 = arith.constant 0 : index
    %120 = vector.load %arg5[%c0_94, %c0_95, %c0_96] : memref<1x8x64xf32, #tpu.memory_space<vmem>>, vector<1x8x64xf32>
    %121 = vector.shape_cast %120 : vector<1x8x64xf32> to vector<8x64xf32>
    %122 = vector.shape_cast %119 : vector<8x64xf32> to vector<1x8x64xf32>
    tpu.vector_store %arg5[%c0_94, %c0_95, %c0_96], %122 {strides = array<i32>} : memref<1x8x64xf32, #tpu.memory_space<vmem>>, vector<1x8x64xf32>,
    return
  }
  func.func @transform_0(%arg0: i32) -> (i32, i32, i32, i32) {
    %c0_i32 = arith.constant 0 : i32
    %c0_i32_0 = arith.constant 0 : i32
    %c0_i32_1 = arith.constant 0 : i32
    %c0_i32_2 = arith.constant 0 : i32
    return %arg0, %c0_i32, %c0_i32_0, %c0_i32_1 : i32, i32, i32, i32
  }
  func.func @transform_1(%arg0: i32) -> (i32, i32) {
    %c0_i32 = arith.constant 0 : i32
    %c0_i32_0 = arith.constant 0 : i32
    %c0_i32_1 = arith.constant 0 : i32
    return %c0_i32, %c0_i32_0 : i32, i32
  }
  func.func @transform_2(%arg0: i32) -> (i32, i32) {
    %c0_i32 = arith.constant 0 : i32
    %c0_i32_0 = arith.constant 0 : i32
    %c0_i32_1 = arith.constant 0 : i32
    return %c0_i32, %c0_i32_0 : i32, i32
  }
  func.func @transform_3(%arg0: i32) -> (i32, i32) {
    %c0_i32 = arith.constant 0 : i32
    %c0_i32_0 = arith.constant 0 : i32
    %c0_i32_1 = arith.constant 0 : i32
    return %c0_i32, %c0_i32_0 : i32, i32
  }
  func.func @transform_4(%arg0: i32) -> (i32, i32, i32) {
    %c0_i32 = arith.constant 0 : i32
    %c0_i32_0 = arith.constant 0 : i32
    %c0_i32_1 = arith.constant 0 : i32
    return %arg0, %c0_i32, %c0_i32_0 : i32, i32, i32
  }
}

</mosaic_0001>

<bundles_post_ra>
// kernel: tpu_custom_call.1
= control target key start
LH: loop header
LB: loop body
LE: loop exit
PB: predicated region body
PF: predicated region fallthrough
CT: control target
= control target key end

     0   :  { %9 = vsyncpa [#allocation6], 0  ;;  %s2489_s0 = inlined_call_operand.vmem [shape: f32[2,8,8,4], index: 0, kind: input, shape index: {}]   ;;  %s2490_s1 = inlined_call_operand.vmem [shape: f32[36,8], index: 1, kind: input, shape index: {}]   ;;  %s2491_s2 = inlined_call_operand.vmem [shape: f32[72,8], index: 2, kind: input, shape index: {}]   ;;  %s2492_s3 = inlined_call_operand.vmem [shape: f32[4,8], index: 3, kind: input, shape index: {}]   ;;  %s2493_s4 = inlined_call_operand.hbm [shape: f32[2,8,64], index: 4, kind: output, shape index: {}]  }
   0x1   :  { %11 = vsyncpa [#allocation6 + $0x1], 0  ;;  %s1820_s15 = smov 0   ;;  %s1822_s16 = smov 0  }
   0x2   :  { %s1824_s17 = smov 0   ;;  %s1826_s18 = smov 0  }
   0x3 LB: > { %s1841_s19 = sadd.s32 4294967295, %s1779_s18   ;;  %s1526_s20 = sadd.s32 4294967294, %s1779_s18   ;;  %s1779_s18 = sphi %s1826_s18, %s2499_s18   ;;  %s1775_s17 = sphi %s1824_s17, %s2498_s17   ;;  %s1771_s16 = sphi %s1822_s16, %s2497_s16   ;;  %s1767_s15 = sphi %s1820_s15, %s2496_s15  }
   0x4   : > { %s1845_s21 = sadd.s32 1, %s1779_s18   ;;  %s113_s22 = sadd.s32 1, %s1775_s17 }
   0x5   : > { %s110_s23 = ssub.s32 %s1779_s18, %s1845_s21  ;;  %p123_p0 = scmp.ne.s32.totalorder %s1775_s17, %s1771_s16 }
   0x6   : > { %p111_p1 = scmp.eq.s32.totalorder %s110_s23, 0  ;;  %p124_p2 = scmp.eq.s32.totalorder %s1841_s19, 1 }
   0x7   : > { %p129_p3 = scmp.ne.s32.totalorder %s1771_s16, %s1767_s15  ;;  %p130_p4 = scmp.eq.s32.totalorder %s1526_s20, 1 }
   0x8   : > { %s1856_s24 = scalar_select %p111_p1, %s1775_s17, %s113_s22  }
   0x9   : > { %p1858_p5 = por %p124_p2, %p123_p0  ;;  %p1862_p6 = por %p130_p4, %p129_p3 }
   0xa   : > { %p1529_p7 = scmp.ge.s32.totalorder %s1779_s18, 1  ;;  %p165_p8 = scmp.lt.s32.totalorder %s1779_s18, 3 }
   0xc   : > { %p166_p9 = pnand %p1529_p7, %p165_p8 }
   0xd   : > { %vm196_vm0 = vcmask (!%p166_p9), 31744   ;;  %vm198_vm1 = vcmask (!%p166_p9), 25600   ;;  %vm203_vm2 = vcmask (!%p166_p9), 24576   ;;  %v1781_v0 = vmov (!%p166_p9), 0.0   ;;  %p191_p10 = scmp.lt.s32.totalorder (!%p166_p9), %s1841_s19, 1  ;;  %s1782_s6 = smov (!%p166_p9), 4  }
   0xe   : > { %169 = sbr.rel (%p166_p9) target bundleno = 1184 (0x4a0), region = 36  ;;  %197 = vst.msk [vmem:[#allocation2] sm:$0xff] (!%p166_p9), %vm196_vm0, %v1781_v0  ;;  %201 = vst.msk [vmem:[#allocation2 + $0x90] sm:$0xff] (!%p166_p9), %vm196_vm0, %v1781_v0  ;;  %vm224_vm3 = vcmask (!%p166_p9), 64512   ;;  %s1783_s7 = smov (!%p166_p9), 8   ;;  %v269_v18 = vld [vmem:[%s2490_s1] sm:$0xff] (!%p166_p9) }
   0xf   : > { %199 = vst.msk [vmem:[#allocation2 + $0x8] sm:$0x3] (!%p166_p9), %vm198_vm1, %v1781_v0  ;;  %202 = vst.msk [vmem:[#allocation2 + $0x98] sm:$0x3] (!%p166_p9), %vm198_vm1, %v1781_v0  ;;  %s1784_s8 = smov (!%p166_p9), 12   ;;  %s1785_s9 = smov (!%p166_p9), 16  }
  0x10   : > { %205 = vst.msk [vmem:[#allocation2 + $0x10] sm:$0x1] (!%p166_p9), %vm203_vm2, %v1781_v0  ;;  %206 = vst.msk [vmem:[#allocation2 + $0x20] sm:$0x1] (!%p166_p9), %vm203_vm2, %v1781_v0  ;;  %s1786_s10 = smov (!%p166_p9), 20   ;;  %v270_v19 = vld [vmem:[%s2490_s1 + $0x8] sm:$0xff] (!%p166_p9) }
  0x11   : > { %207 = vst.msk [vmem:[#allocation2 + $0x30] sm:$0x1] (!%p166_p9), %vm203_vm2, %v1781_v0  ;;  %208 = vst.msk [vmem:[#allocation2 + $0x40] sm:$0x1] (!%p166_p9), %vm203_vm2, %v1781_v0  ;;  %s1787_s20 = smov (!%p166_p9), 24   ;;  %v1637_v20 = vpack.c.bf16 (!%p166_p9), %v270_v19, %v269_v18  ;;  %v271_v23 = vld [vmem:[%s2490_s1 + $0x10] sm:$0xff] (!%p166_p9) }
  0x12   : > { %209 = vst.msk [vmem:[#allocation2 + $0x50] sm:$0x1] (!%p166_p9), %vm203_vm2, %v1781_v0  ;;  %210 = vst.msk [vmem:[#allocation2 + $0x60] sm:$0x1] (!%p166_p9), %vm203_vm2, %v1781_v0  ;;  %v272_v24 = vld [vmem:[%s2490_s1 + $0x18] sm:$0xff] (!%p166_p9)  ;;  %vm620_vm4 = vcmask (!%p166_p9), 1043456  }
  0x13   : > { %211 = vst.msk [vmem:[#allocation2 + $0x70] sm:$0x1] (!%p166_p9), %vm203_vm2, %v1781_v0  ;;  %212 = vst.msk [vmem:[#allocation2 + $0x80] sm:$0x1] (!%p166_p9), %vm203_vm2, %v1781_v0  ;;  %1638 = vmatprep.subr.bf16.mxu0 (!%p166_p9), %v1637_v20  ;;  %v1641_v25 = vpack.c.bf16 (!%p166_p9), %v272_v24, %v271_v23  ;;  %v273_v26 = vld [vmem:[%s2490_s1 + $0x20] sm:$0xf] (!%p166_p9) }
  0x14   : > { %215 = vst.msk [vmem:[#allocation2 + $0x19] sm:$0x1] (!%p166_p9), %vm203_vm2, %v1781_v0  ;;  %216 = vst.msk [vmem:[#allocation2 + $0x29] sm:$0x1] (!%p166_p9), %vm203_vm2, %v1781_v0  ;;  %1640 = vmatpush3.bf16.msra.mxu0 (!%p166_p9), %v1637_v20  ;;  %s1789_s11 = smov (!%p166_p9), 32   ;;  %vm541_vm5 = vcmask (!%p166_p9), 97280  }
  0x15   : > { %217 = vst.msk [vmem:[#allocation2 + $0x39] sm:$0x1] %vm203_vm2, %v1781_v0  ;;  %218 = vst.msk [vmem:[#allocation2 + $0x49] sm:$0x1] %vm203_vm2, %v1781_v0  ;;  %s192_s27 = scalar_select %p191_p10, %s1841_s19, 1  ;;  %1642 = vmatprep.subr.bf16.mxu0 %v1641_v25  ;;  %vm550_vm6 = vcmask 130048  }
  0x16   : > { %219 = vst.msk [vmem:[#allocation2 + $0x59] sm:$0x1] %vm203_vm2, %v1781_v0  ;;  %220 = vst.msk [vmem:[#allocation2 + $0x69] sm:$0x1] %vm203_vm2, %v1781_v0  ;;  %v284_v4 = vld [vmem:[#allocation2 + $0x1] sm:$0xff]  ;;  %v293_v45 = vld [vmem:[#allocation2 + $0x91] sm:$0xff] }
  0x17   : > { %221 = vst.msk [vmem:[#allocation2 + $0x79] sm:$0x1] %vm203_vm2, %v1781_v0  ;;  %222 = vst.msk [vmem:[#allocation2 + $0x89] sm:$0x1] %vm203_vm2, %v1781_v0  ;;  %s1554_s28 = sshll.u32 %s192_s27, 6  ;;  %312 = vrot.lane.b32.xlu0 %v284_v4, %s1782_s6  ;;  %vm559_vm7 = vcmask 162816  }
  0x18   : > { %214 = vst.msk [vmem:[#allocation2 + $0x9] sm:$0x1] %vm203_vm2, %v1781_v0  ;;  %204 = vst.msk [vmem:[#allocation2] sm:$0x1] %vm203_vm2, %v1781_v0  ;;  %s195_s5 = scalar_lea.vmem %s2489_s0, %s1554_s28  ;;  %1644 = vmatpush3.bf16.msra.mxu0 %v1641_v25  ;;  %vm568_vm8 = vcmask 195584   ;;  %vm577_vm9 = vcmask 228352  }
  0x19   : > { %213 = vst.msk [vmem:[#allocation2 + $0x90] sm:$0x1] %vm203_vm2, %v1781_v0  ;;  %223 = vst.msk [vmem:[#allocation2 + $0x99] sm:$0x1] %vm203_vm2, %v1781_v0  ;;  %v252_v1 = vld [vmem:[%s195_s5] sm:$0xff]  ;;  %v253_v2 = vld [vmem:[%s195_s5 + $0x8] sm:$0xff]  ;;  %1593 = vmatprep.subr.msk.mxu0 %vm620_vm4, %v273_v26 }
  0x1a   : > { %225 = vst.msk [vmem:[#allocation3] sm:$0xff] %vm224_vm3, %v1781_v0  ;;  %229 = vst.msk [vmem:[#allocation3 + $0x90] sm:$0xff] %vm224_vm3, %v1781_v0  ;;  %v254_v3 = vld [vmem:[%s195_s5 + $0x10] sm:$0xff]  ;;  %v255_v5 = vld [vmem:[%s195_s5 + $0x18] sm:$0xff]  ;;  %vm586_vm10 = vcmask 261120   ;;  %vm595_vm11 = vcmask 293888  }
  0x1b   : > { %261 = vst.msk [vmem:[#allocation2 + $0x11] sm:$0xff] %vm196_vm0, %v252_v1  ;;  %262 = vst.msk [vmem:[#allocation2 + $0x21] sm:$0xff] %vm196_vm0, %v253_v2  ;;  %v256_v6 = vld [vmem:[%s195_s5 + $0x20] sm:$0xff]  ;;  %v257_v8 = vld [vmem:[%s195_s5 + $0x28] sm:$0xff]  ;;  %vm226_vm12 = vcmask 58368   ;;  %vm231_vm13 = vcmask 57344  }
  0x1c   : > { %263 = vst.msk [vmem:[#allocation2 + $0x31] sm:$0xff] %vm196_vm0, %v254_v3  ;;  %264 = vst.msk [vmem:[#allocation2 + $0x41] sm:$0xff] %vm196_vm0, %v255_v5  ;;  %v258_v9 = vld [vmem:[%s195_s5 + $0x30] sm:$0xff]  ;;  %v259_v10 = vld [vmem:[%s195_s5 + $0x38] sm:$0xff]  ;;  %s1788_s5 = smov 28   ;;  %1594 = vmatpush3.msk.msra.mxu0 %vm620_vm4, %v273_v26  ;;  %s1792_s29 = smov 40  }
  0x1d   : > { %265 = vst.msk [vmem:[#allocation2 + $0x51] sm:$0xff] %vm196_vm0, %v256_v6  ;;  %266 = vst.msk [vmem:[#allocation2 + $0x61] sm:$0xff] %vm196_vm0, %v257_v8  ;;  %s1793_s13 = smov 64   ;;  %vm1142_vm14 = vcmask 326656   ;;  %vm1151_vm15 = vcmask 392192   ;;  %vm1169_vm1 = vcmask 523264  }
  0x1e   : > { %267 = vst.msk [vmem:[#allocation2 + $0x71] sm:$0xff] %vm196_vm0, %v258_v9  ;;  %268 = vst.msk [vmem:[#allocation2 + $0x81] sm:$0xff] %vm196_vm0, %v259_v10  ;;  %vm1178_vm2 = vcmask 588800  }
  0x1f   : > { %v294_v7 = vld [vmem:[#allocation2 + $0x2] sm:$0xff]  ;;  %227 = vst.msk [vmem:[#allocation3 + $0x8] sm:$0x3] %vm226_vm12, %v1781_v0  ;;  %230 = vst.msk [vmem:[#allocation3 + $0x98] sm:$0x3] %vm226_vm12, %v1781_v0 }
  0x20   : > { %344 = vrot.lane.b32.xlu1 %v294_v7, %s1783_s7  ;;  %v283_v44 = vld [vmem:[#allocation2 + $0x90] sm:$0xff]  ;;  %v274_v61 = vld [vmem:[#allocation2] sm:$0xff]  ;;  %241 = vst.msk [vmem:[#allocation3 + $0x90] sm:$0x1] %vm231_vm13, %v1781_v0  ;;  %232 = vst.msk [vmem:[#allocation3] sm:$0x1] %vm231_vm13, %v1781_v0 }
  0x21   : > { %v303_v48 = vld [vmem:[#allocation2 + $0x92] sm:$0xff]  ;;  %233 = vst.msk [vmem:[#allocation3 + $0x10] sm:$0x1] %vm231_vm13, %v1781_v0  ;;  %234 = vst.msk [vmem:[#allocation3 + $0x20] sm:$0x1] %vm231_vm13, %v1781_v0 }
  0x22   : > { %v295_v11 = vld [vmem:[#allocation2 + $0x12] sm:$0xff]  ;;  %v1935_v13 = vld [vmem:[#allocation2 + $0x20] sm:$0xff]  ;;  %235 = vst.msk [vmem:[#allocation3 + $0x30] sm:$0x1] %vm231_vm13, %v1781_v0  ;;  %236 = vst.msk [vmem:[#allocation3 + $0x40] sm:$0x1] %vm231_vm13, %v1781_v0 }
  0x23   : > { %v285_v12 = vld [vmem:[#allocation2 + $0x11] sm:$0xff]  ;;  %v286_v15 = vld [vmem:[#allocation2 + $0x21] sm:$0xff]  ;;  %237 = vst.msk [vmem:[#allocation3 + $0x50] sm:$0x1] %vm231_vm13, %v1781_v0  ;;  %238 = vst.msk [vmem:[#allocation3 + $0x60] sm:$0x1] %vm231_vm13, %v1781_v0 }
  0x24   : > { %346 = vrot.lane.b32.xlu1 %v295_v11, %s1783_s7  ;;  %314 = vrot.lane.b32.xlu0 %v285_v12, %s1782_s6  ;;  %v1937_v14 = vld [vmem:[#allocation2 + $0x10] sm:$0xff]  ;;  %v296_v16 = vld [vmem:[#allocation2 + $0x22] sm:$0xff]  ;;  %239 = vst.msk [vmem:[#allocation3 + $0x70] sm:$0x1] %vm231_vm13, %v1781_v0  ;;  %240 = vst.msk [vmem:[#allocation3 + $0x80] sm:$0x1] %vm231_vm13, %v1781_v0 }
  0x25   : > { %v287_v17 = vld [vmem:[#allocation2 + $0x31] sm:$0xff]  ;;  %v1975_v27 = vld [vmem:[#allocation2 + $0x40] sm:$0xff]  ;;  %242 = vst.msk [vmem:[#allocation3 + $0x9] sm:$0x1] %vm231_vm13, %v1781_v0  ;;  %243 = vst.msk [vmem:[#allocation3 + $0x19] sm:$0x1] %vm231_vm13, %v1781_v0 }
  0x26   : > { %v1958_v21 = vld [vmem:[#allocation2 + $0x30] sm:$0xff]  ;;  %v288_v28 = vld [vmem:[#allocation2 + $0x41] sm:$0xff]  ;;  %244 = vst.msk [vmem:[#allocation3 + $0x29] sm:$0x1] %vm231_vm13, %v1781_v0  ;;  %245 = vst.msk [vmem:[#allocation3 + $0x39] sm:$0x1] %vm231_vm13, %v1781_v0 }
  0x27   : > { %v297_v22 = vld [vmem:[#allocation2 + $0x32] sm:$0xff]  ;;  %v298_v29 = vld [vmem:[#allocation2 + $0x42] sm:$0xff]  ;;  %246 = vst.msk [vmem:[#allocation3 + $0x49] sm:$0x1] %vm231_vm13, %v1781_v0  ;;  %247 = vst.msk [vmem:[#allocation3 + $0x59] sm:$0x1] %vm231_vm13, %v1781_v0 }
  0x28   : > { %378 = vrot.lane.b32.xlu1 %v1935_v13, %s1784_s8  ;;  %376 = vrot.lane.b32.xlu0 %v1937_v14, %s1784_s8  ;;  %v289_v30 = vld [vmem:[#allocation2 + $0x51] sm:$0xff]  ;;  %v1999_v33 = vld [vmem:[#allocation2 + $0x60] sm:$0xff]  ;;  %248 = vst.msk [vmem:[#allocation3 + $0x69] sm:$0x1] %vm231_vm13, %v1781_v0  ;;  %249 = vst.msk [vmem:[#allocation3 + $0x79] sm:$0x1] %vm231_vm13, %v1781_v0 }
  0x29   : > { %v1991_v31 = vld [vmem:[#allocation2 + $0x50] sm:$0xff]  ;;  %v290_v34 = vld [vmem:[#allocation2 + $0x61] sm:$0xff]  ;;  %250 = vst.msk [vmem:[#allocation3 + $0x89] sm:$0x1] %vm231_vm13, %v1781_v0  ;;  %251 = vst.msk [vmem:[#allocation3 + $0x99] sm:$0x1] %vm231_vm13, %v1781_v0 }
  0x2a   : > { %v299_v32 = vld [vmem:[#allocation2 + $0x52] sm:$0xff]  ;;  %v300_v35 = vld [vmem:[#allocation2 + $0x62] sm:$0xff] }
  0x2b   : > { %v291_v36 = vld [vmem:[#allocation2 + $0x71] sm:$0xff]  ;;  %v282_v39 = vld [vmem:[#allocation2 + $0x80] sm:$0xff] }
  0x2c   : > { %316 = vrot.lane.b32.xlu1 %v286_v15, %s1782_s6  ;;  %401 = vrot.lane.b32.xlu0 %v285_v12, %s1785_s9  ;;  %v2015_v37 = vld [vmem:[#allocation2 + $0x70] sm:$0xff]  ;;  %v292_v40 = vld [vmem:[#allocation2 + $0x81] sm:$0xff] }
  0x2d   : > { %v301_v38 = vld [vmem:[#allocation2 + $0x72] sm:$0xff]  ;;  %v302_v41 = vld [vmem:[#allocation2 + $0x82] sm:$0xff] }
  0x30   : > { %426 = vrot.lane.b32.xlu1 %v295_v11, %s1786_s10  ;;  %403 = vrot.lane.b32.xlu0 %v286_v15, %s1785_s9 }
  0x34   : > { %348 = vrot.lane.b32.xlu1 %v296_v16, %s1783_s7  ;;  %318 = vrot.lane.b32.xlu0 %v287_v17, %s1782_s6 }
  0x38   : > { %451 = vrot.lane.b32.xlu1 %v1935_v13, %s1787_s20  ;;  %428 = vrot.lane.b32.xlu0 %v296_v16, %s1786_s10 }
  0x3c   : > { %380 = vrot.lane.b32.xlu1 %v1958_v21, %s1784_s8  ;;  %350 = vrot.lane.b32.xlu0 %v297_v22, %s1783_s7 }
  0x40   : > { %476 = vrot.lane.b32.xlu1 %v286_v15, %s1788_s5  ;;  %453 = vrot.lane.b32.xlu0 %v1958_v21, %s1787_s20 }
  0x44   : > { %405 = vrot.lane.b32.xlu1 %v287_v17, %s1785_s9  ;;  %382 = vrot.lane.b32.xlu0 %v1975_v27, %s1784_s8 }
  0x48   : > { %501 = vrot.lane.b32.xlu1 %v296_v16, %s1789_s11  ;;  %478 = vrot.lane.b32.xlu0 %v287_v17, %s1788_s5 }
  0x4c   : > { %407 = vrot.lane.b32.xlu1 %v288_v28, %s1785_s9  ;;  %320 = vrot.lane.b32.xlu0 %v288_v28, %s1782_s6 }
  0x50   : > { %503 = vrot.lane.b32.xlu1 %v297_v22, %s1789_s11  ;;  %430 = vrot.lane.b32.xlu0 %v297_v22, %s1786_s10 }
  0x54   : > { %352 = vrot.lane.b32.xlu1 %v298_v29, %s1783_s7  ;;  %322 = vrot.lane.b32.xlu0 %v289_v30, %s1782_s6 }
  0x58   : > { %455 = vrot.lane.b32.xlu1 %v1975_v27, %s1787_s20  ;;  %432 = vrot.lane.b32.xlu0 %v298_v29, %s1786_s10 }
  0x5c   : > { %384 = vrot.lane.b32.xlu1 %v1991_v31, %s1784_s8  ;;  %354 = vrot.lane.b32.xlu0 %v299_v32, %s1783_s7 }
  0x60   : > { %480 = vrot.lane.b32.xlu1 %v288_v28, %s1788_s5  ;;  %457 = vrot.lane.b32.xlu0 %v1991_v31, %s1787_s20 }
  0x64   : > { %409 = vrot.lane.b32.xlu1 %v289_v30, %s1785_s9  ;;  %386 = vrot.lane.b32.xlu0 %v1999_v33, %s1784_s8 }
  0x68   : > { %505 = vrot.lane.b32.xlu1 %v298_v29, %s1789_s11  ;;  %482 = vrot.lane.b32.xlu0 %v289_v30, %s1788_s5 }
  0x6c   : > { %411 = vrot.lane.b32.xlu1 %v290_v34, %s1785_s9  ;;  %324 = vrot.lane.b32.xlu0 %v290_v34, %s1782_s6 }
  0x70   : > { %507 = vrot.lane.b32.xlu1 %v299_v32, %s1789_s11  ;;  %434 = vrot.lane.b32.xlu0 %v299_v32, %s1786_s10 }
  0x74   : > { %356 = vrot.lane.b32.xlu1 %v300_v35, %s1783_s7  ;;  %326 = vrot.lane.b32.xlu0 %v291_v36, %s1782_s6  ;;  %s1790_s6 = smov 48  }
  0x78   : > { %459 = vrot.lane.b32.xlu1 %v1999_v33, %s1787_s20  ;;  %436 = vrot.lane.b32.xlu0 %v300_v35, %s1786_s10 }
  0x7c   : > { %388 = vrot.lane.b32.xlu1 %v2015_v37, %s1784_s8  ;;  %358 = vrot.lane.b32.xlu0 %v301_v38, %s1783_s7 }
  0x80   : > { %484 = vrot.lane.b32.xlu1 %v290_v34, %s1788_s5  ;;  %461 = vrot.lane.b32.xlu0 %v2015_v37, %s1787_s20 }
  0x84   : > { %413 = vrot.lane.b32.xlu1 %v291_v36, %s1785_s9  ;;  %390 = vrot.lane.b32.xlu0 %v282_v39, %s1784_s8  ;;  %s1791_s8 = smov 56  }
  0x88   : > { %509 = vrot.lane.b32.xlu1 %v300_v35, %s1789_s11  ;;  %486 = vrot.lane.b32.xlu0 %v291_v36, %s1788_s5 }
  0x89   : > { %v313_v43 = vpop.permute.xlu0 %312 }
  0x8a   : > { %v525_v62 = vsel %vm196_vm0, %v274_v61, %v313_v43 }
  0x8c   : > { %438 = vrot.lane.b32.xlu1 %v301_v38, %s1786_s10  ;;  %415 = vrot.lane.b32.xlu0 %v292_v40, %s1785_s9 }
  0x90   : > { %440 = vrot.lane.b32.xlu1 %v302_v41, %s1786_s10  ;;  %511 = vrot.lane.b32.xlu0 %v301_v38, %s1789_s11 }
  0x92   : > { %v345_v42 = vpop.permute.xlu1 %344 }
  0x93   : > { %v533_v2 = vsel %vm224_vm3, %v525_v62, %v345_v42 }
  0x94   : > { %465 = vrot.lane.b32.xlu1 %v283_v44, %s1787_s20  ;;  %463 = vrot.lane.b32.xlu0 %v282_v39, %s1787_s20 }
  0x96   : > { %v347_v46 = vpop.permute.xlu1 %346  ;;  %v315_v47 = vpop.permute.xlu0 %314 }
  0x97   : > { %v526_v9 = vsel %vm196_vm0, %v1937_v14, %v315_v47 }
  0x98   : > { %490 = vrot.lane.b32.xlu1 %v293_v45, %s1788_s5  ;;  %488 = vrot.lane.b32.xlu0 %v292_v40, %s1788_s5  ;;  %v534_v16 = vsel %vm224_vm3, %v526_v9, %v347_v46 }
  0x9a   : > { %v379_v49 = vpop.permute.xlu1 %378  ;;  %v377_v50 = vpop.permute.xlu0 %376 }
  0x9b   : > { %v542_v3 = vsel %vm541_vm5, %v533_v2, %v377_v50  ;;  %v543_v17 = vsel %vm541_vm5, %v534_v16, %v379_v49 }
  0x9c   : > { %515 = vrot.lane.b32.xlu1 %v303_v48, %s1789_s11  ;;  %513 = vrot.lane.b32.xlu0 %v302_v41, %s1789_s11 }
  0x9e   : > { %v317_v51 = vpop.permute.xlu1 %316  ;;  %v402_v52 = vpop.permute.xlu0 %401 }
  0x9f   : > { %v551_v6 = vsel %vm550_vm6, %v542_v3, %v402_v52  ;;  %v527_v39 = vsel %vm196_vm0, %v1935_v13, %v317_v51 }
  0xa2   : > { %v427_v53 = vpop.permute.xlu1 %426  ;;  %v404_v54 = vpop.permute.xlu0 %403 }
  0xa3   : > { %v560_v7 = vsel %vm559_vm7, %v551_v6, %v427_v53  ;;  %v552_v20 = vsel %vm550_vm6, %v543_v17, %v404_v54 }
  0xa6   : > { %v349_v55 = vpop.permute.xlu1 %348  ;;  %v319_v56 = vpop.permute.xlu0 %318 }
  0xa7   : > { %v535_v40 = vsel %vm224_vm3, %v527_v39, %v349_v55  ;;  %v528_v13 = vsel %vm196_vm0, %v1958_v21, %v319_v56 }
  0xaa   : > { %v452_v57 = vpop.permute.xlu1 %451  ;;  %v429_v58 = vpop.permute.xlu0 %428 }
  0xab   : > { %v569_v8 = vsel %vm568_vm8, %v560_v7, %v452_v57  ;;  %v561_v22 = vsel %vm559_vm7, %v552_v20, %v429_v58 }
  0xae   : > { %v381_v59 = vpop.permute.xlu1 %380  ;;  %v351_v60 = vpop.permute.xlu0 %350 }
  0xaf   : > { %v544_v41 = vsel %vm541_vm5, %v535_v40, %v381_v59  ;;  %v536_v51 = vsel %vm224_vm3, %v528_v13, %v351_v60 }
  0xb2   : > { %v477_v63 = vpop.permute.xlu1 %476  ;;  %v454_v1 = vpop.permute.xlu0 %453 }
  0xb3   : > { %v578_v10 = vsel %vm577_vm9, %v569_v8, %v477_v63  ;;  %v570_v14 = vsel %vm568_vm8, %v561_v22, %v454_v1 }
  0xb6   : > { %v406_v4 = vpop.permute.xlu1 %405  ;;  %v383_v5 = vpop.permute.xlu0 %382 }
  0xb7   : > { %v553_v44 = vsel %vm550_vm6, %v544_v41, %v406_v4  ;;  %v545_v52 = vsel %vm541_vm5, %v536_v51, %v383_v5 }
  0xba   : > { %v502_v11 = vpop.permute.xlu1 %501  ;;  %v479_v12 = vpop.permute.xlu0 %478 }
  0xbb   : > { %v587_v15 = vsel %vm586_vm10, %v578_v10, %v502_v11  ;;  %v579_v23 = vsel %vm577_vm9, %v570_v14, %v479_v12 }
  0xbc   : > { %1595 = vmatprep.mubr.msk.f32.mxu0 %vm595_vm11, %v587_v15 }
  0xbe   : > { %v408_v18 = vpop.permute.xlu1 %407  ;;  %v321_v19 = vpop.permute.xlu0 %320 }
  0xbf   : > { %v554_v55 = vsel %vm550_vm6, %v545_v52, %v408_v18  ;;  %v529_v6 = vsel %vm196_vm0, %v1975_v27, %v321_v19 }
  0xc2   : > { %v504_v24 = vpop.permute.xlu1 %503  ;;  %v431_v25 = vpop.permute.xlu0 %430 }
  0xc3   : > { %v588_v26 = vsel %vm586_vm10, %v579_v23, %v504_v24  ;;  %v562_v45 = vsel %vm559_vm7, %v553_v44, %v431_v25 }
  0xc4   : > { %1596 = vmatmul.mubr.msk.f32.vlgmr.msra.gmra.mrb[0].mxu0 %vm595_vm11, %v588_v26 }
  0xc6   : > { %v353_v28 = vpop.permute.xlu1 %352  ;;  %v323_v29 = vpop.permute.xlu0 %322 }
  0xc7   : > { %v537_v7 = vsel %vm224_vm3, %v529_v6, %v353_v28  ;;  %v530_v27 = vsel %vm196_vm0, %v1991_v31, %v323_v29 }
  0xca   : > { %v456_v30 = vpop.permute.xlu1 %455  ;;  %v433_v32 = vpop.permute.xlu0 %432 }
  0xcb   : > { %v571_v46 = vsel %vm568_vm8, %v562_v45, %v456_v30  ;;  %v563_v57 = vsel %vm559_vm7, %v554_v55, %v433_v32  ;;  %v868_v55 = vld [vmem:[#allocation3 + $0x90] sm:$0xff] }
  0xcc   : > { %1050 = vrot.lane.b32.xlu1 %v868_v55, %s1790_s6 }
  0xce   : > { %v385_v34 = vpop.permute.xlu1 %384  ;;  %v355_v35 = vpop.permute.xlu0 %354 }
  0xcf   : > { %v546_v8 = vsel %vm541_vm5, %v537_v7, %v385_v34  ;;  %v538_v19 = vsel %vm224_vm3, %v530_v27, %v355_v35 }
  0xd2   : > { %v481_v36 = vpop.permute.xlu1 %480  ;;  %v458_v38 = vpop.permute.xlu0 %457 }
  0xd3   : > { %v580_v47 = vsel %vm577_vm9, %v571_v46, %v481_v36  ;;  %v572_v58 = vsel %vm568_vm8, %v563_v57, %v458_v38 }
  0xd6   : > { %v410_v42 = vpop.permute.xlu1 %409  ;;  %v387_v43 = vpop.permute.xlu0 %386 }
  0xd7   : > { %v555_v11 = vsel %vm550_vm6, %v546_v8, %v410_v42  ;;  %v547_v22 = vsel %vm541_vm5, %v538_v19, %v387_v43 }
  0xda   : > { %v506_v48 = vpop.permute.xlu1 %505  ;;  %v483_v49 = vpop.permute.xlu0 %482 }
  0xdb   : > { %v589_v50 = vsel %vm586_vm10, %v580_v47, %v506_v48  ;;  %v581_v59 = vsel %vm577_vm9, %v572_v58, %v483_v49 }
  0xdc   : > { %1598 = vmatprep.mubr.msk.f32.mxu0 %vm595_vm11, %v589_v50 }
  0xde   : > { %v412_v53 = vpop.permute.xlu1 %411  ;;  %v325_v54 = vpop.permute.xlu0 %324 }
  0xdf   : > { %v556_v24 = vsel %vm550_vm6, %v547_v22, %v412_v53  ;;  %v531_v35 = vsel %vm196_vm0, %v1999_v33, %v325_v54  ;;  %v869_v53 = vld [vmem:[#allocation3 + $0x1] sm:$0xff] }
  0xe0   : > { %897 = vrot.lane.b32.xlu0 %v869_v53, %s1783_s7 }
  0xe2   : > { %v508_v61 = vpop.permute.xlu1 %507  ;;  %v435_v62 = vpop.permute.xlu0 %434 }
  0xe3   : > { %v590_v21 = vsel %vm586_vm10, %v581_v59, %v508_v61  ;;  %v564_v12 = vsel %vm559_vm7, %v555_v11, %v435_v62  ;;  %v879_v61 = vld [vmem:[#allocation3 + $0x2] sm:$0xff] }
  0xe4   : > { %1599 = vmatmul.mubr.msk.f32.gmra.mrb[2].mxu0 %vm595_vm11, %v590_v21  ;;  %929 = vrot.lane.b32.xlu0 %v879_v61, %s1785_s9  ;;  %v878_v21 = vld [vmem:[#allocation3 + $0x91] sm:$0xff]  ;;  %v789_v61 = vld [vmem:[%s2492_s3] sm:$0x1] }
  0xe5   : > { %1075 = vrot.lane.b32.xlu1 %v878_v21, %s1791_s8 }
  0xe6   : > { %v357_v56 = vpop.permute.xlu1 %356  ;;  %v327_v60 = vpop.permute.xlu0 %326 }
  0xe7   : > { %v532_v36 = vsel %vm196_vm0, %v2015_v37, %v327_v60  ;;  %v539_v38 = vsel %vm224_vm3, %v531_v35, %v357_v56  ;;  %vm1160_vm0 = vcmask 457728  }
  0xea   : > { %v460_v63 = vpop.permute.xlu1 %459  ;;  %v437_v1 = vpop.permute.xlu0 %436 }
  0xeb   : > { %v573_v15 = vsel %vm568_vm8, %v564_v12, %v460_v63  ;;  %v565_v25 = vsel %vm559_vm7, %v556_v24, %v437_v1 }
  0xee   : > { %v389_v2 = vpop.permute.xlu1 %388  ;;  %v359_v3 = vpop.permute.xlu0 %358 }
  0xef   : > { %v540_v39 = vsel %vm224_vm3, %v532_v36, %v359_v3  ;;  %v548_v40 = vsel %vm541_vm5, %v539_v38, %v389_v2 }
  0xf2   : > { %v485_v4 = vpop.permute.xlu1 %484  ;;  %v462_v5 = vpop.permute.xlu0 %461 }
  0xf3   : > { %v582_v16 = vsel %vm577_vm9, %v573_v15, %v485_v4  ;;  %v574_v26 = vsel %vm568_vm8, %v565_v25, %v462_v5 }
  0xf6   : > { %v414_v9 = vpop.permute.xlu1 %413  ;;  %v391_v10 = vpop.permute.xlu0 %390 }
  0xf7   : > { %v549_v41 = vsel %vm541_vm5, %v540_v39, %v391_v10  ;;  %v557_v44 = vsel %vm550_vm6, %v548_v40, %v414_v9 }
  0xfa   : > { %v510_v17 = vpop.permute.xlu1 %509  ;;  %v487_v18 = vpop.permute.xlu0 %486 }
  0xfb   : > { %v591_v20 = vsel %vm586_vm10, %v582_v16, %v510_v17  ;;  %v583_v28 = vsel %vm577_vm9, %v574_v26, %v487_v18 }
  0xfc   : > { %1601 = vmatprep.mubr.msk.f32.mxu0 %vm595_vm11, %v591_v20 }
  0xfe   : > { %v439_v14 = vpop.permute.xlu1 %438  ;;  %v416_v23 = vpop.permute.xlu0 %415 }
  0xff   : > { %v558_v45 = vsel %vm550_vm6, %v549_v41, %v416_v23  ;;  %v566_v46 = vsel %vm559_vm7, %v557_v44, %v439_v14 }
 0x102   : > { %v441_v30 = vpop.permute.xlu1 %440  ;;  %v512_v32 = vpop.permute.xlu0 %511 }
 0x103   : > { %v592_v31 = vsel %vm586_vm10, %v583_v28, %v512_v32  ;;  %v567_v33 = vsel %vm559_vm7, %v558_v45, %v441_v30 }
 0x104   : > { %1602 = vmatmul.mubr.msk.f32.gmra.mrb[4].mxu0 %vm595_vm11, %v592_v31 }
 0x106   : > { %v466_v29 = vpop.permute.xlu1 %465  ;;  %v464_v34 = vpop.permute.xlu0 %463 }
 0x107   : > { %v576_v37 = vsel %vm568_vm8, %v567_v33, %v466_v29  ;;  %v575_v47 = vsel %vm568_vm8, %v566_v46, %v464_v34 }
 0x10a   : > { %v491_v42 = vpop.permute.xlu1 %490  ;;  %v489_v43 = vpop.permute.xlu0 %488 }
 0x10b   : > { %v585_v48 = vsel %vm577_vm9, %v576_v37, %v491_v42  ;;  %v584_v49 = vsel %vm577_vm9, %v575_v47, %v489_v43 }
 0x10e   : > { %v516_v50 = vpop.permute.xlu1 %515  ;;  %v514_v13 = vpop.permute.xlu0 %513 }
 0x10f   : > { %v594_v51 = vsel %vm586_vm10, %v585_v48, %v516_v50  ;;  %v593_v52 = vsel %vm586_vm10, %v584_v49, %v514_v13 }
 0x110   : > { %1604 = vmatprep.mubr.msk.f32.mxu0 %vm595_vm11, %v593_v52 }
 0x111   : > { %1605 = vmatmul.mubr.msk.f32.gmra.mrb[6].mxu0 %vm595_vm11, %v594_v51 }
 0x197   : > { %v1597_v54 = vpop.f32.mrb[0].mxu0 }
 0x198   : > { %730 = vst.msk [vmem:[#allocation4 + $0x8] sm:$0xff] %vm224_vm3, %v1597_v54  ;;  %v738_v57 = vsel %vm224_vm3, %v1597_v54, 0.0  ;;  %v760_v58 = vmul.f32 %v1597_v54, %v1597_v54  ;;  %v690_v59 = vpop.f32.mrb[1].mxu0 }
 0x199   : > { %729 = vst.msk [vmem:[#allocation4] sm:$0xff] %vm224_vm3, %v690_v59  ;;  %v737_v62 = vsel %vm224_vm3, %v690_v59, 0.0  ;;  %v759_v0 = vmul.f32 %v690_v59, %v690_v59 }
 0x19a   : > { %v768_v56 = vsel %vm224_vm3, %v760_v58, 0.0  ;;  %v739_v60 = vadd.f32 %v738_v57, %v737_v62  ;;  %v809_v58 = vlaneseq }
 0x19b   : > { %v767_v63 = vsel %vm224_vm3, %v759_v0, 0.0 }
 0x19c   : > { %v769_v1 = vadd.f32 %v768_v56, %v767_v63  ;;  %v810_v59 = vshrl.u32 %v809_v58, 7  ;;  %v790_v56 = vld [vmem:[%s2492_s3 + $0x1] sm:$0x1] }
 0x19e   : > { %v2189_v62 = vsub.s32 0, %v810_v59  ;;  %v858_v59 = vld [vmem:[%s2491_s2 + $0x40] sm:$0xff] }
 0x1b7   : > { %v1600_v2 = vpop.f32.mrb[2].mxu0 }
 0x1b8   : > { %732 = vst.msk [vmem:[#allocation4 + $0x18] sm:$0xff] %vm224_vm3, %v1600_v2  ;;  %v700_v3 = vpop.f32.mrb[3].mxu0  ;;  %v762_v4 = vmul.f32 %v1600_v2, %v1600_v2  ;;  %v742_v8 = vsel %vm224_vm3, %v1600_v2, 0.0 }
 0x1b9   : > { %731 = vst.msk [vmem:[#allocation4 + $0x10] sm:$0xff] %vm224_vm3, %v700_v3  ;;  %v740_v5 = vsel %vm224_vm3, %v700_v3, 0.0  ;;  %v761_v6 = vmul.f32 %v700_v3, %v700_v3 }
 0x1ba   : > { %v741_v7 = vadd.f32 %v740_v5, %v739_v60  ;;  %v772_v12 = vsel %vm224_vm3, %v762_v4, 0.0  ;;  %v801_v4 = vld [vmem:[#allocation4] sm:$0xff] }
 0x1bb   : > { %v770_v9 = vsel %vm224_vm3, %v761_v6, 0.0 }
 0x1bc   : > { %v771_v10 = vadd.f32 %v770_v9, %v769_v1  ;;  %v743_v11 = vadd.f32 %v742_v8, %v741_v7  ;;  %v802_v1 = vld [vmem:[#allocation4 + $0x8] sm:$0xff] }
 0x1be   : > { %v773_v15 = vadd.f32 %v772_v12, %v771_v10 }
 0x1bf   : > { %v804_v5 = vld [vmem:[#allocation4 + $0x18] sm:$0xff] }
 0x1c0   : > { %v803_v6 = vld [vmem:[#allocation4 + $0x10] sm:$0xff] }
 0x1d7   : > { %v1603_v16 = vpop.f32.mrb[4].mxu0 }
 0x1d8   : > { %734 = vst.msk [vmem:[#allocation4 + $0x28] sm:$0xff] %vm224_vm3, %v1603_v16  ;;  %v710_v17 = vpop.f32.mrb[5].mxu0  ;;  %v764_v18 = vmul.f32 %v1603_v16, %v1603_v16  ;;  %v746_v22 = vsel %vm224_vm3, %v1603_v16, 0.0 }
 0x1d9   : > { %733 = vst.msk [vmem:[#allocation4 + $0x20] sm:$0xff] %vm224_vm3, %v710_v17  ;;  %v744_v20 = vsel %vm224_vm3, %v710_v17, 0.0  ;;  %v763_v27 = vmul.f32 %v710_v17, %v710_v17 }
 0x1da   : > { %v745_v19 = vadd.f32 %v744_v20, %v743_v11  ;;  %v776_v25 = vsel %vm224_vm3, %v764_v18, 0.0 }
 0x1db   : > { %v774_v14 = vsel %vm224_vm3, %v763_v27, 0.0 }
 0x1dc   : > { %v775_v23 = vadd.f32 %v774_v14, %v773_v15  ;;  %v747_v24 = vadd.f32 %v746_v22, %v745_v19 }
 0x1de   : > { %v777_v26 = vadd.f32 %v776_v25, %v775_v23 }
 0x1df   : > { %v806_v8 = vld [vmem:[#allocation4 + $0x28] sm:$0xff] }
 0x1e0   : > { %v805_v9 = vld [vmem:[#allocation4 + $0x20] sm:$0xff] }
 0x1e4   : > { %v1606_v28 = vpop.f32.mrb[6].mxu0 }
 0x1e5   : > { %736 = vst.msk [vmem:[#allocation4 + $0x38] sm:$0xff] %vm224_vm3, %v1606_v28  ;;  %v720_v30 = vpop.f32.mrb[7].mxu0  ;;  %v766_v32 = vmul.f32 %v1606_v28, %v1606_v28  ;;  %v750_v35 = vsel %vm224_vm3, %v1606_v28, 0.0 }
 0x1e6   : > { %735 = vst.msk [vmem:[#allocation4 + $0x30] sm:$0xff] %vm224_vm3, %v720_v30  ;;  %v748_v31 = vsel %vm224_vm3, %v720_v30, 0.0  ;;  %v765_v29 = vmul.f32 %v720_v30, %v720_v30 }
 0x1e7   : > { %v749_v34 = vadd.f32 %v748_v31, %v747_v24  ;;  %v780_v40 = vsel %vm224_vm3, %v766_v32, 0.0 }
 0x1e8   : > { %v778_v36 = vsel %vm224_vm3, %v765_v29, 0.0 }
 0x1e9   : > { %v751_v38 = vadd.f32 %v750_v35, %v749_v34  ;;  %v779_v39 = vadd.f32 %v778_v36, %v777_v26 }
 0x1eb   : > { %v752_v41 = vrot.slane %v751_v38, 4  ;;  %v781_v42 = vadd.f32 %v780_v40, %v779_v39 }
 0x1ec   : > { %v808_v10 = vld [vmem:[#allocation4 + $0x38] sm:$0xff] }
 0x1ed   : > { %v753_v43 = vadd.f32 %v752_v41, %v751_v38  ;;  %v782_v44 = vrot.slane %v781_v42, 4  ;;  %v807_v3 = vld [vmem:[#allocation4 + $0x30] sm:$0xff] }
 0x1ef   : > { %v754_v45 = vrot.slane %v753_v43, 2  ;;  %v783_v46 = vadd.f32 %v782_v44, %v781_v42 }
 0x1f1   : > { %v755_v33 = vadd.f32 %v754_v45, %v753_v43  ;;  %v784_v37 = vrot.slane %v783_v46, 2 }
 0x1f3   : > { %v756_v47 = vrot.slane %v755_v33, 1  ;;  %v785_v48 = vadd.f32 %v784_v37, %v783_v46  ;;  %v850_v46 = vld [vmem:[%s2491_s2] sm:$0xff] }
 0x1f5   : > { %v757_v49 = vadd.f32 %v756_v47, %v755_v33  ;;  %v786_v50 = vrot.slane %v785_v48, 1  ;;  %v851_v33 = vld [vmem:[%s2491_s2 + $0x8] sm:$0xff] }
 0x1f6   : > { %v1645_v37 = vpack.c.bf16 %v851_v33, %v850_v46 }
 0x1f7   : > { %v787_v13 = vadd.f32 %v786_v50, %v785_v48  ;;  %v791_v51 = vmul.f32 0.015625, %v757_v49  ;;  %v852_v48 = vld [vmem:[%s2491_s2 + $0x10] sm:$0xff]  ;;  %v853_v49 = vld [vmem:[%s2491_s2 + $0x18] sm:$0xff] }
 0x1f8   : > { %1646 = vmatprep.subr.bf16.mxu1 %v1645_v37  ;;  %v1649_v50 = vpack.c.bf16 %v853_v49, %v852_v48 }
 0x1f9   : > { %v792_v52 = vmul.f32 0.015625, %v787_v13  ;;  %v793_v53 = vmul.f32 %v791_v51, %v791_v51  ;;  %1648 = vmatpush3.bf16.msra.mxu1 %v1645_v37 }
 0x1fa   : > { %1650 = vmatprep.subr.bf16.mxu1 %v1649_v50 }
 0x1fb   : > { %v794_v54 = vsub.f32 %v792_v52, %v793_v53  ;;  %v855_v52 = vld [vmem:[%s2491_s2 + $0x28] sm:$0xff] }
 0x1fd   : > { %v795_v55 = vmax.f32 %v794_v54, 0.0  ;;  %1652 = vmatpush3.bf16.msra.mxu1 %v1649_v50 }
 0x1ff   : > { %v796_v57 = vadd.f32 1e-05, %v795_v55  ;;  %v856_v55 = vld [vmem:[%s2491_s2 + $0x30] sm:$0xff] }
 0x201   : > { %1713 = vrsqrt.f32 %v796_v57  ;;  %v857_v57 = vld [vmem:[%s2491_s2 + $0x38] sm:$0xff] }
 0x202   : > { %v1657_v58 = vpack.c.bf16 %v857_v57, %v856_v55 }
 0x20b   : > { %v1714_v0 = vpop.eup %1713 }
 0x20c   : > { %v798_v21 = vmul.f32 %v1714_v0, %v789_v61 }
 0x20e   : > { %v799_v60 = vmul.f32 %v798_v21, %v791_v51  ;;  %v812_v63 = vrot.slane %v798_v21, %v2189_v62  ;;  %v854_v51 = vld [vmem:[%s2491_s2 + $0x20] sm:$0xff] }
 0x20f   : > { %v1653_v53 = vpack.c.bf16 %v855_v52, %v854_v51 }
 0x210   : > { %v800_v2 = vsub.f32 %v790_v56, %v799_v60  ;;  %v819_v7 = vmul.f32 %v812_v63, %v807_v3  ;;  %v813_v12 = vmul.f32 %v812_v63, %v801_v4  ;;  %v814_v15 = vmul.f32 %v812_v63, %v802_v1 }
 0x211   : > { %v815_v16 = vmul.f32 %v812_v63, %v803_v6  ;;  %v816_v17 = vmul.f32 %v812_v63, %v804_v5  ;;  %v817_v18 = vmul.f32 %v812_v63, %v805_v9  ;;  %v818_v20 = vmul.f32 %v812_v63, %v806_v8  ;;  %1654 = vmatprep.subr.bf16.mxu1 %v1653_v53  ;;  %v2310_v8 = vpop.permute.xlu1 %1050  ;;  %v898_v9 = vpop.permute.xlu0 %897 }
 0x212   : > { %v824_v11 = vrot.slane %v800_v2, %v2189_v62  ;;  %v820_v27 = vmul.f32 %v812_v63, %v808_v10  ;;  %1656 = vmatpush3.bf16.msra.mxu1 %v1653_v53 }
 0x213   : > { %1658 = vmatprep.subr.bf16.mxu1 %v1657_v58 }
 0x214   : > { %v831_v19 = vadd.f32 %v824_v11, %v819_v7  ;;  %v825_v22 = vadd.f32 %v824_v11, %v813_v12  ;;  %v826_v14 = vadd.f32 %v824_v11, %v814_v15  ;;  %v827_v23 = vadd.f32 %v824_v11, %v815_v16  ;;  %v888_v15 = vld [vmem:[#allocation3 + $0x92] sm:$0xff] }
 0x215   : > { %v828_v24 = vadd.f32 %v824_v11, %v816_v17  ;;  %v829_v25 = vadd.f32 %v824_v11, %v817_v18  ;;  %v830_v26 = vadd.f32 %v824_v11, %v818_v20  ;;  %v832_v28 = vadd.f32 %v824_v11, %v820_v27  ;;  %v2316_v10 = vpop.permute.xlu1 %1075  ;;  %v930_v11 = vpop.permute.xlu0 %929 }
 0x216   : > { %v839_v30 = vmax.f32 %v831_v19, 0.0  ;;  %v833_v32 = vmax.f32 %v825_v22, 0.0  ;;  %v834_v31 = vmax.f32 %v826_v14, 0.0  ;;  %v835_v29 = vmax.f32 %v827_v23, 0.0  ;;  %1660 = vmatpush3.bf16.msra.mxu1 %v1657_v58 }
 0x217   : > { %v836_v34 = vmax.f32 %v828_v24, 0.0  ;;  %v837_v35 = vmax.f32 %v829_v25, 0.0  ;;  %v838_v36 = vmax.f32 %v830_v26, 0.0  ;;  %v840_v38 = vmax.f32 %v832_v28, 0.0  ;;  %1623 = vmatprep.subr.mxu1 %v858_v59 }
 0x218   : > { %848 = vst.msk [vmem:[#allocation3 + $0x71] sm:$0xff] %vm224_vm3, %v839_v30  ;;  %842 = vst.msk [vmem:[#allocation3 + $0x11] sm:$0xff] %vm224_vm3, %v833_v32 }
 0x219   : > { %843 = vst.msk [vmem:[#allocation3 + $0x21] sm:$0xff] %vm224_vm3, %v834_v31  ;;  %844 = vst.msk [vmem:[#allocation3 + $0x31] sm:$0xff] %vm224_vm3, %v835_v29  ;;  %v859_v29 = vld [vmem:[#allocation3] sm:$0xff] }
 0x21a   : > { %845 = vst.msk [vmem:[#allocation3 + $0x41] sm:$0xff] %vm224_vm3, %v836_v34  ;;  %846 = vst.msk [vmem:[#allocation3 + $0x51] sm:$0xff] %vm224_vm3, %v837_v35  ;;  %1624 = vmatpush3.msra.mxu1 %v858_v59  ;;  %v1110_v34 = vsel %vm224_vm3, %v859_v29, %v898_v9 }
 0x21b   : > { %847 = vst.msk [vmem:[#allocation3 + $0x61] sm:$0xff] %vm224_vm3, %v838_v36  ;;  %849 = vst.msk [vmem:[#allocation3 + $0x81] sm:$0xff] %vm224_vm3, %v840_v38  ;;  %v1118_v38 = vsel %vm550_vm6, %v1110_v34, %v930_v11 }
 0x21f   : > { %v870_v39 = vld [vmem:[#allocation3 + $0x11] sm:$0xff] }
 0x220   : > { %v2204_v40 = vld [vmem:[#allocation3 + $0x10] sm:$0xff]  ;;  %899 = vrot.lane.b32.xlu1 %v870_v39, %s1783_s7  ;;  %v2211_v42 = vld [vmem:[#allocation3 + $0x20] sm:$0xff] }
 0x221   : > { %961 = vrot.lane.b32.xlu0 %v2204_v40, %s1787_s20  ;;  %v880_v41 = vld [vmem:[#allocation3 + $0x12] sm:$0xff]  ;;  %v871_v43 = vld [vmem:[#allocation3 + $0x21] sm:$0xff] }
 0x222   : > { %v872_v44 = vld [vmem:[#allocation3 + $0x31] sm:$0xff]  ;;  %v881_v45 = vld [vmem:[#allocation3 + $0x22] sm:$0xff] }
 0x223   : > { %v882_v47 = vld [vmem:[#allocation3 + $0x32] sm:$0xff]  ;;  %v2246_v54 = vld [vmem:[#allocation3 + $0x40] sm:$0xff] }
 0x224   : > { %931 = vrot.lane.b32.xlu1 %v880_v41, %s1785_s9  ;;  %v2234_v13 = vld [vmem:[#allocation3 + $0x30] sm:$0xff]  ;;  %v873_v61 = vld [vmem:[#allocation3 + $0x41] sm:$0xff] }
 0x225   : > { %986 = vrot.lane.b32.xlu0 %v870_v39, %s1789_s11  ;;  %v874_v0 = vld [vmem:[#allocation3 + $0x51] sm:$0xff]  ;;  %v883_v21 = vld [vmem:[#allocation3 + $0x42] sm:$0xff] }
 0x226   : > { %v884_v56 = vld [vmem:[#allocation3 + $0x52] sm:$0xff]  ;;  %v2279_v63 = vld [vmem:[#allocation3 + $0x60] sm:$0xff] }
 0x227   : > { %v2273_v60 = vld [vmem:[#allocation3 + $0x50] sm:$0xff]  ;;  %v875_v1 = vld [vmem:[#allocation3 + $0x61] sm:$0xff] }
 0x228   : > { %963 = vrot.lane.b32.xlu1 %v2211_v42, %s1787_s20  ;;  %v876_v2 = vld [vmem:[#allocation3 + $0x71] sm:$0xff]  ;;  %v885_v3 = vld [vmem:[#allocation3 + $0x62] sm:$0xff] }
 0x229   : > { %988 = vrot.lane.b32.xlu0 %v871_v43, %s1789_s11  ;;  %v886_v4 = vld [vmem:[#allocation3 + $0x72] sm:$0xff]  ;;  %v867_v6 = vld [vmem:[#allocation3 + $0x80] sm:$0xff] }
 0x22a   : > { %v2297_v5 = vld [vmem:[#allocation3 + $0x70] sm:$0xff]  ;;  %v877_v7 = vld [vmem:[#allocation3 + $0x81] sm:$0xff] }
 0x22b   : > { %v887_v12 = vld [vmem:[#allocation3 + $0x82] sm:$0xff] }
 0x22c   : > { %901 = vrot.lane.b32.xlu1 %v871_v43, %s1783_s7 }
 0x22d   : > { %903 = vrot.lane.b32.xlu0 %v872_v44, %s1783_s7 }
 0x230   : > { %1011 = vrot.lane.b32.xlu1 %v880_v41, %s1792_s29 }
 0x231   : > { %1013 = vrot.lane.b32.xlu0 %v881_v45, %s1792_s29 }
 0x234   : > { %933 = vrot.lane.b32.xlu1 %v881_v45, %s1785_s9 }
 0x235   : > { %935 = vrot.lane.b32.xlu0 %v882_v47, %s1785_s9 }
 0x238   : > { %1036 = vrot.lane.b32.xlu1 %v2211_v42, %s1790_s6 }
 0x239   : > { %1038 = vrot.lane.b32.xlu0 %v2234_v13, %s1790_s6 }
 0x23c   : > { %965 = vrot.lane.b32.xlu1 %v2234_v13, %s1787_s20 }
 0x23d   : > { %967 = vrot.lane.b32.xlu0 %v2246_v54, %s1787_s20 }
 0x240   : > { %1061 = vrot.lane.b32.xlu1 %v871_v43, %s1791_s8 }
 0x241   : > { %1063 = vrot.lane.b32.xlu0 %v872_v44, %s1791_s8 }
 0x244   : > { %990 = vrot.lane.b32.xlu1 %v872_v44, %s1789_s11 }
 0x245   : > { %905 = vrot.lane.b32.xlu0 %v873_v61, %s1783_s7 }
 0x248   : > { %1086 = vrot.lane.b32.xlu1 %v881_v45, %s1793_s13 }
 0x249   : > { %1015 = vrot.lane.b32.xlu0 %v882_v47, %s1792_s29 }
 0x24c   : > { %992 = vrot.lane.b32.xlu1 %v873_v61, %s1789_s11 }
 0x24d   : > { %907 = vrot.lane.b32.xlu0 %v874_v0, %s1783_s7 }
 0x250   : > { %1088 = vrot.lane.b32.xlu1 %v882_v47, %s1793_s13 }
 0x251   : > { %1017 = vrot.lane.b32.xlu0 %v883_v21, %s1792_s29 }
 0x254   : > { %937 = vrot.lane.b32.xlu1 %v883_v21, %s1785_s9 }
 0x255   : > { %939 = vrot.lane.b32.xlu0 %v884_v56, %s1785_s9 }
 0x258   : > { %1040 = vrot.lane.b32.xlu1 %v2246_v54, %s1790_s6 }
 0x259   : > { %1042 = vrot.lane.b32.xlu0 %v2273_v60, %s1790_s6 }
 0x25c   : > { %969 = vrot.lane.b32.xlu1 %v2273_v60, %s1787_s20 }
 0x25d   : > { %971 = vrot.lane.b32.xlu0 %v2279_v63, %s1787_s20 }
 0x260   : > { %1065 = vrot.lane.b32.xlu1 %v873_v61, %s1791_s8 }
 0x261   : > { %1067 = vrot.lane.b32.xlu0 %v874_v0, %s1791_s8 }
 0x264   : > { %994 = vrot.lane.b32.xlu1 %v874_v0, %s1789_s11 }
 0x265   : > { %909 = vrot.lane.b32.xlu0 %v875_v1, %s1783_s7 }
 0x268   : > { %1090 = vrot.lane.b32.xlu1 %v883_v21, %s1793_s13 }
 0x269   : > { %1019 = vrot.lane.b32.xlu0 %v884_v56, %s1792_s29 }
 0x26c   : > { %996 = vrot.lane.b32.xlu1 %v875_v1, %s1789_s11 }
 0x26d   : > { %911 = vrot.lane.b32.xlu0 %v876_v2, %s1783_s7 }
 0x270   : > { %1092 = vrot.lane.b32.xlu1 %v884_v56, %s1793_s13 }
 0x271   : > { %1021 = vrot.lane.b32.xlu0 %v885_v3, %s1792_s29 }
 0x274   : > { %941 = vrot.lane.b32.xlu1 %v885_v3, %s1785_s9 }
 0x275   : > { %943 = vrot.lane.b32.xlu0 %v886_v4, %s1785_s9 }
 0x278   : > { %1044 = vrot.lane.b32.xlu1 %v2279_v63, %s1790_s6 }
 0x279   : > { %1046 = vrot.lane.b32.xlu0 %v2297_v5, %s1790_s6 }
 0x27c   : > { %973 = vrot.lane.b32.xlu1 %v2297_v5, %s1787_s20 }
 0x27d   : > { %975 = vrot.lane.b32.xlu0 %v867_v6, %s1787_s20 }
 0x280   : > { %1069 = vrot.lane.b32.xlu1 %v875_v1, %s1791_s8 }
 0x281   : > { %1071 = vrot.lane.b32.xlu0 %v876_v2, %s1791_s8 }
 0x284   : > { %998 = vrot.lane.b32.xlu1 %v876_v2, %s1789_s11 }
 0x285   : > { %1000 = vrot.lane.b32.xlu0 %v877_v7, %s1789_s11 }
 0x288   : > { %1094 = vrot.lane.b32.xlu1 %v885_v3, %s1793_s13 }
 0x289   : > { %1096 = vrot.lane.b32.xlu0 %v886_v4, %s1793_s13 }
 0x28c   : > { %1023 = vrot.lane.b32.xlu1 %v886_v4, %s1792_s29 }
 0x28d   : > { %1048 = vrot.lane.b32.xlu0 %v867_v6, %s1790_s6  ;;  %s188_s6 = sand.u32 1, %s1771_s16  }
 0x28e   : > { %s1454_s30 = scalar_lea.sflag [#allocation6], %s188_s6 }
 0x290   : > { %1025 = vrot.lane.b32.xlu1 %v887_v12, %s1792_s29  ;;  %s1551_s29 = sshll.u32 %s1841_s19, 7  ;;  %s1794_s19 = smov [#allocation5]  }
 0x291   : > { %1073 = vrot.lane.b32.xlu0 %v877_v7, %s1791_s8  ;;  %s1530_s8 = sshll.u32 %s188_s6, 3  ;;  %s2446_s28 = scalar_lea.hbm %s2493_s4, %s1551_s29 }
 0x292   : > { %v900_v16 = vpop.permute.xlu1 %899  ;;  %s190_s14 = scalar_lea.vmem [#allocation5], %s1530_s8  ;;  %s1721_s10 = sshll.u32 %s1794_s19, 4  ;;  %s1722_s10 = int_to_ptr.vmem [resolvable:$false] %s1721_s10 }
 0x293   : > { %v962_v17 = vpop.permute.xlu0 %961  ;;  %v1111_v33 = vsel %vm224_vm3, %v2204_v40, %v900_v16  ;;  %s1467_s22 = sshll.u32 %s190_s14, 4  ;;  %s1723_s12 = scalar_lea.vmem %s1722_s10, 256  ;;  %s2448_s22 = int_to_ptr.vmem [resolvable:$true] %s1467_s22 }
 0x294   : > { %1100 = vrot.lane.b32.xlu1 %v888_v15, %s1793_s13  ;;  %v1126_v39 = vsel %vm568_vm8, %v1118_v38, %v962_v17  ;;  %s1717_s5 = scalar_lea.vmem %s2448_s22, 128  ;;  %p1724_p0 = scmp.lt.s32.totalorder %s2448_s22, %s1722_s10 }
 0x295   : > { %1098 = vrot.lane.b32.xlu0 %v887_v12, %s1793_s13  ;;  %p1718_p11 = scmp.ne.s32.totalorder %s2448_s22, %s1717_s5  ;;  %p1725_p1 = scmp.lt.s32.totalorder %s1723_s12, %s1717_s5 }
 0x296   : > { %v932_v18 = vpop.permute.xlu1 %931 }
 0x297   : > { %v987_v20 = vpop.permute.xlu0 %986  ;;  %v1119_v49 = vsel %vm550_vm6, %v1111_v33, %v932_v18  ;;  %p1719_p12 = pnand %p1718_p11, %p1858_p5  ;;  %p1726_p2 = por %p1725_p1, %p1724_p0 }
 0x298   : > { %v1134_v44 = vsel %vm586_vm10, %v1126_v39, %v987_v20 }
 0x299   : > { %p1720_p13 = pneg %p1719_p12 }
 0x29a   : > { %v964_v27 = vpop.permute.xlu1 %963 }
 0x29b   : > { %v989_v19 = vpop.permute.xlu0 %988  ;;  %v1127_v51 = vsel %vm568_vm8, %v1119_v49, %v964_v27  ;;  %p1727_p3 = pnand %p1726_p2, %p1720_p13 }
 0x29c   : > { %v1135_v55 = vsel %vm586_vm10, %v1127_v51, %v989_v19 }
 0x29e   : > { %v902_v22 = vpop.permute.xlu1 %901 }
 0x29f   : > { %v2322_v14 = vpop.permute.xlu0 %903  ;;  %v1112_v9 = vsel %vm224_vm3, %v2211_v42, %v902_v22 }
 0x2a0   : > { %v1113_v42 = vsel %vm224_vm3, %v2234_v13, %v2322_v14 }
 0x2a2   : > { %v1012_v23 = vpop.permute.xlu1 %1011 }
 0x2a3   : > { %v1014_v24 = vpop.permute.xlu0 %1013  ;;  %v1143_v45 = vsel %vm1142_vm14, %v1134_v44, %v1012_v23 }
 0x2a4   : > { %v1144_v57 = vsel %vm1142_vm14, %v1135_v55, %v1014_v24 }
 0x2a6   : > { %v934_v25 = vpop.permute.xlu1 %933 }
 0x2a7   : > { %v936_v26 = vpop.permute.xlu0 %935  ;;  %v1120_v11 = vsel %vm550_vm6, %v1112_v9, %v934_v25 }
 0x2a8   : > { %v1121_v22 = vsel %vm550_vm6, %v1113_v42, %v936_v26 }
 0x2aa   : > { %v1037_v28 = vpop.permute.xlu1 %1036 }
 0x2ab   : > { %v1039_v30 = vpop.permute.xlu0 %1038  ;;  %v1152_v46 = vsel %vm1151_vm15, %v1143_v45, %v1037_v28 }
 0x2ac   : > { %v1153_v40 = vsel %vm1151_vm15, %v1144_v57, %v1039_v30 }
 0x2ae   : > { %v966_v32 = vpop.permute.xlu1 %965 }
 0x2af   : > { %v968_v31 = vpop.permute.xlu0 %967  ;;  %v1128_v12 = vsel %vm568_vm8, %v1120_v11, %v966_v32 }
 0x2b0   : > { %v1129_v25 = vsel %vm568_vm8, %v1121_v22, %v968_v31 }
 0x2b2   : > { %v1062_v35 = vpop.permute.xlu1 %1061 }
 0x2b3   : > { %v1064_v36 = vpop.permute.xlu0 %1063  ;;  %v1161_v37 = vsel %vm1160_vm0, %v1152_v46, %v1062_v35 }
 0x2b4   : > { %v1162_v58 = vsel %vm1160_vm0, %v1153_v40, %v1064_v36 }
 0x2b6   : > { %v991_v41 = vpop.permute.xlu1 %990 }
 0x2b7   : > { %v2327_v43 = vpop.permute.xlu0 %905  ;;  %v1136_v17 = vsel %vm586_vm10, %v1128_v12, %v991_v41 }
 0x2b8   : > { %v1114_v33 = vsel %vm224_vm3, %v2246_v54, %v2327_v43 }
 0x2ba   : > { %v1087_v47 = vpop.permute.xlu1 %1086 }
 0x2bb   : > { %v1016_v48 = vpop.permute.xlu0 %1015  ;;  %v1170_v50 = vsel %vm1169_vm1, %v1161_v37, %v1087_v47 }
 0x2bc   : > { %1625 = vmatprep.mubr.msk.f32.mxu1 %vm1178_vm2, %v1170_v50  ;;  %v1145_v18 = vsel %vm1142_vm14, %v1136_v17, %v1016_v48 }
 0x2be   : > { %v993_v52 = vpop.permute.xlu1 %992 }
 0x2bf   : > { %v908_v53 = vpop.permute.xlu0 %907  ;;  %v1137_v32 = vsel %vm586_vm10, %v1129_v25, %v993_v52 }
 0x2c0   : > { %v1115_v37 = vsel %vm224_vm3, %v2273_v60, %v908_v53 }
 0x2c2   : > { %v1089_v59 = vpop.permute.xlu1 %1088 }
 0x2c3   : > { %v1018_v61 = vpop.permute.xlu0 %1017  ;;  %v1171_v0 = vsel %vm1169_vm1, %v1162_v58, %v1089_v59 }
 0x2c4   : > { %1626 = vmatmul.mubr.msk.f32.vlgmr.msra.gmra.mrb[0].mxu1 %vm1178_vm2, %v1171_v0  ;;  %v1146_v29 = vsel %vm1142_vm14, %v1137_v32, %v1018_v61 }
 0x2c6   : > { %v938_v21 = vpop.permute.xlu1 %937 }
 0x2c7   : > { %v940_v56 = vpop.permute.xlu0 %939  ;;  %v1122_v47 = vsel %vm550_vm6, %v1114_v33, %v938_v21 }
 0x2c8   : > { %v1123_v48 = vsel %vm550_vm6, %v1115_v37, %v940_v56 }
 0x2ca   : > { %v1041_v1 = vpop.permute.xlu1 %1040 }
 0x2cb   : > { %v1043_v2 = vpop.permute.xlu0 %1042  ;;  %v1154_v20 = vsel %vm1151_vm15, %v1145_v18, %v1041_v1 }
 0x2cc   : > { %v1155_v34 = vsel %vm1151_vm15, %v1146_v29, %v1043_v2 }
 0x2ce   : > { %v970_v3 = vpop.permute.xlu1 %969 }
 0x2cf   : > { %v972_v4 = vpop.permute.xlu0 %971  ;;  %v1130_v49 = vsel %vm568_vm8, %v1122_v47, %v970_v3 }
 0x2d0   : > { %v1131_v50 = vsel %vm568_vm8, %v1123_v48, %v972_v4 }
 0x2d2   : > { %v1066_v6 = vpop.permute.xlu1 %1065 }
 0x2d3   : > { %v1068_v7 = vpop.permute.xlu0 %1067  ;;  %v1163_v27 = vsel %vm1160_vm0, %v1154_v20, %v1066_v6 }
 0x2d4   : > { %v1164_v35 = vsel %vm1160_vm0, %v1155_v34, %v1068_v7 }
 0x2d6   : > { %v995_v15 = vpop.permute.xlu1 %994 }
 0x2d7   : > { %v910_v16 = vpop.permute.xlu0 %909  ;;  %v1138_v55 = vsel %vm586_vm10, %v1130_v49, %v995_v15 }
 0x2d8   : > { %v1116_v56 = vsel %vm224_vm3, %v2279_v63, %v910_v16 }
 0x2da   : > { %v1091_v19 = vpop.permute.xlu1 %1090 }
 0x2db   : > { %v1020_v23 = vpop.permute.xlu0 %1019  ;;  %v1172_v24 = vsel %vm1169_vm1, %v1163_v27, %v1091_v19 }
 0x2dc   : > { %1628 = vmatprep.mubr.msk.f32.mxu1 %vm1178_vm2, %v1172_v24  ;;  %v1147_v40 = vsel %vm1142_vm14, %v1138_v55, %v1020_v23 }
 0x2de   : > { %v997_v28 = vpop.permute.xlu1 %996 }
 0x2df   : > { %v912_v30 = vpop.permute.xlu0 %911  ;;  %v1139_v57 = vsel %vm586_vm10, %v1131_v50, %v997_v28 }
 0x2e0   : > { %v1117_v3 = vsel %vm224_vm3, %v2297_v5, %v912_v30 }
 0x2e2   : > { %v1093_v36 = vpop.permute.xlu1 %1092 }
 0x2e3   : > { %v1022_v38 = vpop.permute.xlu0 %1021  ;;  %v1173_v13 = vsel %vm1169_vm1, %v1164_v35, %v1093_v36 }
 0x2e4   : > { %1629 = vmatmul.mubr.msk.f32.gmra.mrb[2].mxu1 %vm1178_vm2, %v1173_v13  ;;  %v1148_v54 = vsel %vm1142_vm14, %v1139_v57, %v1022_v38 }
 0x2e6   : > { %v942_v14 = vpop.permute.xlu1 %941 }
 0x2e7   : > { %v944_v26 = vpop.permute.xlu0 %943  ;;  %v1124_v4 = vsel %vm550_vm6, %v1116_v56, %v942_v14 }
 0x2e8   : > { %v1125_v6 = vsel %vm550_vm6, %v1117_v3, %v944_v26 }
 0x2ea   : > { %v1045_v39 = vpop.permute.xlu1 %1044 }
 0x2eb   : > { %v1047_v31 = vpop.permute.xlu0 %1046  ;;  %v1156_v60 = vsel %vm1151_vm15, %v1147_v40, %v1045_v39 }
 0x2ec   : > { %v1157_v43 = vsel %vm1151_vm15, %v1148_v54, %v1047_v31 }
 0x2ee   : > { %v974_v44 = vpop.permute.xlu1 %973 }
 0x2ef   : > { %v976_v41 = vpop.permute.xlu0 %975  ;;  %v1132_v7 = vsel %vm568_vm8, %v1124_v4, %v974_v44 }
 0x2f0   : > { %v1133_v9 = vsel %vm568_vm8, %v1125_v6, %v976_v41 }
 0x2f2   : > { %v1070_v46 = vpop.permute.xlu1 %1069 }
 0x2f3   : > { %v1072_v45 = vpop.permute.xlu0 %1071  ;;  %v1165_v58 = vsel %vm1160_vm0, %v1156_v60, %v1070_v46 }
 0x2f4   : > { %v1166_v53 = vsel %vm1160_vm0, %v1157_v43, %v1072_v45 }
 0x2f6   : > { %v999_v52 = vpop.permute.xlu1 %998 }
 0x2f7   : > { %v1001_v51 = vpop.permute.xlu0 %1000  ;;  %v1140_v11 = vsel %vm586_vm10, %v1132_v7, %v999_v52 }
 0x2f8   : > { %v1141_v12 = vsel %vm586_vm10, %v1133_v9, %v1001_v51 }
 0x2fa   : > { %v1095_v61 = vpop.permute.xlu1 %1094 }
 0x2fb   : > { %v1097_v59 = vpop.permute.xlu0 %1096  ;;  %v1174_v21 = vsel %vm1169_vm1, %v1165_v58, %v1095_v61 }
 0x2fc   : > { %v1175_v0 = vsel %vm1169_vm1, %v1166_v53, %v1097_v59  ;;  %1631 = vmatprep.mubr.msk.f32.mxu1 %vm1178_vm2, %v1174_v21 }
 0x2fd   : > { %1632 = vmatmul.mubr.msk.f32.gmra.mrb[4].mxu1 %vm1178_vm2, %v1175_v0 }
 0x2fe   : > { %v1024_v2 = vpop.permute.xlu1 %1023 }
 0x2ff   : > { %v1049_v1 = vpop.permute.xlu0 %1048  ;;  %v1149_v15 = vsel %vm1142_vm14, %v1140_v11, %v1024_v2 }
 0x300   : > { %v1158_v18 = vsel %vm1151_vm15, %v1149_v15, %v1049_v1 }
 0x302   : > { %v1026_v16 = vpop.permute.xlu1 %1025 }
 0x303   : > { %v1074_v63 = vpop.permute.xlu0 %1073  ;;  %v1150_v17 = vsel %vm1142_vm14, %v1141_v12, %v1026_v16 }
 0x304   : > { %v1159_v5 = vsel %vm1151_vm15, %v1150_v17, %v2310_v8  ;;  %v1167_v27 = vsel %vm1160_vm0, %v1158_v18, %v1074_v63 }
 0x305   : > { %v1168_v20 = vsel %vm1160_vm0, %v1159_v5, %v2316_v10 }
 0x306   : > { %v1101_v23 = vpop.permute.xlu1 %1100 }
 0x307   : > { %v1099_v19 = vpop.permute.xlu0 %1098  ;;  %v1177_v42 = vsel %vm1169_vm1, %v1168_v20, %v1101_v23 }
 0x308   : > { %v1176_v24 = vsel %vm1169_vm1, %v1167_v27, %v1099_v19 }
 0x309   : > { %1634 = vmatprep.mubr.msk.f32.mxu1 %vm1178_vm2, %v1176_v24 }
 0x30a   : > { %1635 = vmatmul.mubr.msk.f32.gmra.mrb[6].mxu1 %vm1178_vm2, %v1177_v42 }
 0x397   : > { %v1627_v22 = vpop.f32.mrb[0].mxu1 }
 0x398   : > { %1309 = vst.msk [vmem:[#allocation4 + $0x8] sm:$0xff] %vm224_vm3, %v1627_v22  ;;  %v1317_v8 = vsel %vm224_vm3, %v1627_v22, 0.0  ;;  %v1339_v25 = vmul.f32 %v1627_v22, %v1627_v22  ;;  %v1269_v28 = vpop.f32.mrb[1].mxu1 }
 0x399   : > { %1308 = vst.msk [vmem:[#allocation4] sm:$0xff] %vm224_vm3, %v1269_v28  ;;  %v1316_v10 = vsel %vm224_vm3, %v1269_v28, 0.0  ;;  %v1338_v30 = vmul.f32 %v1269_v28, %v1269_v28 }
 0x39a   : > { %v1347_v32 = vsel %vm224_vm3, %v1339_v25, 0.0  ;;  %v1318_v29 = vadd.f32 %v1317_v8, %v1316_v10  ;;  %v1368_v8 = vld [vmem:[%s2492_s3 + $0x2] sm:$0x1]  ;;  %v1369_v10 = vld [vmem:[%s2492_s3 + $0x3] sm:$0x1] }
 0x39b   : > { %v1346_v34 = vsel %vm224_vm3, %v1338_v30, 0.0 }
 0x39c   : > { %v1348_v35 = vadd.f32 %v1347_v32, %v1346_v34 }
 0x3a0   : > { %v1380_v34 = vld [vmem:[#allocation4] sm:$0xff] }
 0x3b7   : > { %v1630_v36 = vpop.f32.mrb[2].mxu1 }
 0x3b8   : > { %1311 = vst.msk [vmem:[#allocation4 + $0x18] sm:$0xff] %vm224_vm3, %v1630_v36  ;;  %v1279_v38 = vpop.f32.mrb[3].mxu1  ;;  %v1341_v13 = vmul.f32 %v1630_v36, %v1630_v36  ;;  %v1321_v31 = vsel %vm224_vm3, %v1630_v36, 0.0 }
 0x3b9   : > { %1310 = vst.msk [vmem:[#allocation4 + $0x10] sm:$0xff] %vm224_vm3, %v1279_v38  ;;  %v1319_v14 = vsel %vm224_vm3, %v1279_v38, 0.0  ;;  %v1340_v26 = vmul.f32 %v1279_v38, %v1279_v38 }
 0x3ba   : > { %v1320_v39 = vadd.f32 %v1319_v14, %v1318_v29  ;;  %v1351_v46 = vsel %vm224_vm3, %v1341_v13, 0.0 }
 0x3bb   : > { %v1349_v41 = vsel %vm224_vm3, %v1340_v26, 0.0 }
 0x3bc   : > { %v1350_v44 = vadd.f32 %v1349_v41, %v1348_v35  ;;  %v1322_v45 = vadd.f32 %v1321_v31, %v1320_v39  ;;  %v1381_v35 = vld [vmem:[#allocation4 + $0x8] sm:$0xff] }
 0x3be   : > { %v1352_v33 = vadd.f32 %v1351_v46, %v1350_v44 }
 0x3bf   : > { %v1383_v13 = vld [vmem:[#allocation4 + $0x18] sm:$0xff] }
 0x3c0   : > { %v1382_v38 = vld [vmem:[#allocation4 + $0x10] sm:$0xff] }
 0x3d0   : > { %v1633_v37 = vpop.f32.mrb[4].mxu1 }
 0x3d1   : > { %1313 = vst.msk [vmem:[#allocation4 + $0x28] sm:$0xff] %vm224_vm3, %v1633_v37  ;;  %v1289_v47 = vpop.f32.mrb[5].mxu1  ;;  %v1343_v48 = vmul.f32 %v1633_v37, %v1633_v37  ;;  %v1325_v52 = vsel %vm224_vm3, %v1633_v37, 0.0 }
 0x3d2   : > { %1312 = vst.msk [vmem:[#allocation4 + $0x20] sm:$0xff] %vm224_vm3, %v1289_v47  ;;  %v1323_v49 = vsel %vm224_vm3, %v1289_v47, 0.0  ;;  %v1342_v50 = vmul.f32 %v1289_v47, %v1289_v47 }
 0x3d3   : > { %v1324_v51 = vadd.f32 %v1323_v49, %v1322_v45  ;;  %v1355_v54 = vsel %vm224_vm3, %v1343_v48, 0.0 }
 0x3d4   : > { %v1353_v55 = vsel %vm224_vm3, %v1342_v50, 0.0 }
 0x3d5   : > { %v1354_v57 = vadd.f32 %v1353_v55, %v1352_v33  ;;  %v1326_v40 = vadd.f32 %v1325_v52, %v1324_v51 }
 0x3d7   : > { %v1356_v60 = vadd.f32 %v1355_v54, %v1354_v57 }
 0x3d8   : > { %v1385_v14 = vld [vmem:[#allocation4 + $0x28] sm:$0xff] }
 0x3d9   : > { %v1384_v44 = vld [vmem:[#allocation4 + $0x20] sm:$0xff] }
 0x3dd   : > { %v1636_v43 = vpop.f32.mrb[6].mxu1 }
 0x3de   : > { %1315 = vst.msk [vmem:[#allocation4 + $0x38] sm:$0xff] %vm224_vm3, %v1636_v43  ;;  %v1299_v53 = vpop.f32.mrb[7].mxu1  ;;  %v1345_v58 = vmul.f32 %v1636_v43, %v1636_v43  ;;  %v1329_v21 = vsel %vm224_vm3, %v1636_v43, 0.0 }
 0x3df   : > { %1314 = vst.msk [vmem:[#allocation4 + $0x30] sm:$0xff] %vm224_vm3, %v1299_v53  ;;  %v1327_v59 = vsel %vm224_vm3, %v1299_v53, 0.0  ;;  %v1344_v61 = vmul.f32 %v1299_v53, %v1299_v53 }
 0x3e0   : > { %v1328_v0 = vadd.f32 %v1327_v59, %v1326_v40  ;;  %v1359_v3 = vsel %vm224_vm3, %v1345_v58, 0.0 }
 0x3e1   : > { %v1357_v56 = vsel %vm224_vm3, %v1344_v61, 0.0 }
 0x3e2   : > { %v1330_v1 = vadd.f32 %v1329_v21, %v1328_v0  ;;  %v1358_v2 = vadd.f32 %v1357_v56, %v1356_v60 }
 0x3e4   : > { %v1331_v4 = vrot.slane %v1330_v1, 4  ;;  %v1360_v6 = vadd.f32 %v1359_v3, %v1358_v2 }
 0x3e5   : > { %v1387_v46 = vld [vmem:[#allocation4 + $0x38] sm:$0xff] }
 0x3e6   : > { %v1332_v7 = vadd.f32 %v1331_v4, %v1330_v1  ;;  %v1361_v9 = vrot.slane %v1360_v6, 4  ;;  %v1386_v45 = vld [vmem:[#allocation4 + $0x30] sm:$0xff] }
 0x3e8   : > { %v1333_v11 = vrot.slane %v1332_v7, 2  ;;  %v1362_v12 = vadd.f32 %v1361_v9, %v1360_v6 }
 0x3ea   : > { %v1334_v15 = vadd.f32 %v1333_v11, %v1332_v7  ;;  %v1363_v63 = vrot.slane %v1362_v12, 2 }
 0x3ec   : > { %v1335_v16 = vrot.slane %v1334_v15, 1  ;;  %v1364_v17 = vadd.f32 %v1363_v63, %v1362_v12 }
 0x3ee   : > { %v1336_v5 = vadd.f32 %v1335_v16, %v1334_v15  ;;  %v1365_v18 = vrot.slane %v1364_v17, 1 }
 0x3f0   : > { %v1366_v20 = vadd.f32 %v1365_v18, %v1364_v17  ;;  %v1370_v27 = vmul.f32 0.015625, %v1336_v5 }
 0x3f2   : > { %v1371_v19 = vmul.f32 0.015625, %v1366_v20  ;;  %v1372_v23 = vmul.f32 %v1370_v27, %v1370_v27 }
 0x3f4   : > { %v1373_v24 = vsub.f32 %v1371_v19, %v1372_v23 }
 0x3f6   : > { %v1374_v42 = vmax.f32 %v1373_v24, 0.0 }
 0x3f8   : > { %v1375_v22 = vadd.f32 1e-05, %v1374_v42 }
 0x3fa   : > { %1715 = vrsqrt.f32 %v1375_v22 }
 0x404   : > { %v1716_v25 = vpop.eup %1715 }
 0x405   : > { %v1377_v28 = vmul.f32 %v1716_v25, %v1368_v8 }
 0x407   : > { %v1378_v30 = vmul.f32 %v1377_v28, %v1370_v27  ;;  %v1391_v32 = vrot.slane %v1377_v28, %v2189_v62 }
 0x409   : > { %v1379_v29 = vsub.f32 %v1369_v10, %v1378_v30  ;;  %v1392_v36 = vmul.f32 %v1391_v32, %v1380_v34  ;;  %v1393_v39 = vmul.f32 %v1391_v32, %v1381_v35  ;;  %v1394_v31 = vmul.f32 %v1391_v32, %v1382_v38 }
 0x40a   : > { %v1395_v41 = vmul.f32 %v1391_v32, %v1383_v13  ;;  %v1396_v33 = vmul.f32 %v1391_v32, %v1384_v44  ;;  %v1397_v37 = vmul.f32 %v1391_v32, %v1385_v14  ;;  %v1398_v47 = vmul.f32 %v1391_v32, %v1386_v45 }
 0x40b   : > { %v1403_v26 = vrot.slane %v1379_v29, %v2189_v62  ;;  %v1399_v48 = vmul.f32 %v1391_v32, %v1387_v46 }
 0x40d   : > { %v1404_v49 = vadd.f32 %v1403_v26, %v1392_v36  ;;  %v1405_v50 = vadd.f32 %v1403_v26, %v1393_v39  ;;  %v1406_v51 = vadd.f32 %v1403_v26, %v1394_v31  ;;  %v1407_v52 = vadd.f32 %v1403_v26, %v1395_v41 }
 0x40e   : > { %v1408_v55 = vadd.f32 %v1403_v26, %v1396_v33  ;;  %v1409_v57 = vadd.f32 %v1403_v26, %v1397_v37  ;;  %v1410_v40 = vadd.f32 %v1403_v26, %v1398_v47  ;;  %v1411_v54 = vadd.f32 %v1403_v26, %v1399_v48 }
 0x40f   : > { %v1412_v60 = vmax.f32 %v1404_v49, 0.0  ;;  %v1413_v62 = vmax.f32 %v1405_v50, 0.0  ;;  %v1414_v43 = vmax.f32 %v1406_v51, 0.0  ;;  %v1415_v53 = vmax.f32 %v1407_v52, 0.0 }
 0x410   : > { %v1416_v58 = vmax.f32 %v1408_v55, 0.0  ;;  %v1417_v59 = vmax.f32 %v1409_v57, 0.0  ;;  %v1418_v61 = vmax.f32 %v1410_v40, 0.0  ;;  %v1419_v0 = vmax.f32 %v1411_v54, 0.0 }
 0x411   : > { %1420 = vxpose.xlu0.b32.start [1/8] (short) (narrow) %v1412_v60, 8 }
 0x415   : > { %1421 = vxpose.xlu0.b32.cont [2/8] (short) (narrow) %v1413_v62, 8 }
 0x419   : > { %1422 = vxpose.xlu0.b32.cont [3/8] (short) (narrow) %v1414_v43, 8 }
 0x41d   : > { %1423 = vxpose.xlu0.b32.cont [4/8] (short) (narrow) %v1415_v53, 8 }
 0x421   : > { %1424 = vxpose.xlu0.b32.cont [5/8] (short) (narrow) %v1416_v58, 8 }
 0x425   : > { %1425 = vxpose.xlu0.b32.cont [6/8] (short) (narrow) %v1417_v59, 8 }
 0x429   : > { %1426 = vxpose.xlu0.b32.cont [7/8] (short) (narrow) %v1418_v61, 8 }
 0x42d   : > { %1427 = vxpose.xlu0.b32.end [8/8] (short) (narrow) %v1419_v0, 8 }
 0x491   : > { %v1436_v21 = vpop.trf.xlu0 }
 0x492   : > { %1452 = vst.msk [vmem:[%s190_s14] sm:$0xff] %vm1169_vm1, %v1436_v21 }
 0x493   : > { %1730 = shalt.err (!%p1727_p3)
}
 0x494   : > { %s1731_s13 = scalar_lea.hbm %s2446_s28, 128  ;;  %s1735_s20 = scalar_lea.hbm %s2493_s4, 256 }
 0x495   : > { %p1732_p4 = scmp.ne.s32.totalorder %s2446_s28, %s1731_s13  ;;  %p1736_p9 = scmp.lt.u32.totalorder %s2446_s28, %s2493_s4 }
 0x496   : > { %p1737_p10 = scmp.lt.u32.totalorder %s1735_s20, %s1731_s13  ;;  %p1739_p12 = scmp.lt.u32.totalorder %s1731_s13, %s2446_s28 }
 0x497   : > { %p1733_p7 = pnand %p1732_p4, %p1858_p5 }
 0x498   : > { %p1738_p11 = por %p1737_p10, %p1736_p9 }
 0x499   : > { %p1734_p8 = pneg %p1733_p7 }
 0x49a   : > { %p1740_p13 = por %p1739_p12, %p1738_p11 }
 0x49c   : > { %p1741_p0 = pnand %p1740_p13, %p1734_p8 }
 0x49e   : > { %1744 = shalt.err (!%p1741_p0)
}
 0x49f   : > { %1661 = dma.vmem_to_hbm [thread:$0]  (%p1858_p5), %s2448_s22, 128, %s2446_s28, %s1454_s30  }
 0x4a0 PF: > { %p1667_p1 = scmp.ge.s32.totalorder %s1779_s18, 2  ;;  %s1479_s8 = sand.u32 1, %s1767_s15  }
 0x4a1   : > { %s1480_s29 = scalar_lea.sflag [#allocation6], %s1479_s8 }
 0x4a2   : > { %p1664_p2 = pnand %p1667_p1, %p1862_p6 }
 0x4a4   : > { %1762 = dma.done.wait (!%p1664_p2), %s1480_s29, 128  }
 0x4a5   : > { %1764 = vsyncadd (!%p1664_p2), %s1480_s29, 4294967168  ;;  %p14_p3 = scmp.ge.s32.totalorder %s1845_s21, 4   ;;  %s2496_s15 = smov %s1771_s16 }
 0x4a6   : > { %s2497_s16 = smov %s1775_s17  ;;  %s2498_s17 = smov %s1856_s24 }
 0x4a7   : > { %s2499_s18 = smov %s1845_s21  ;;  %16 = sbr.rel (!%p14_p3) target bundleno = 3 (0x3), region = 75 }
 0x4ae   :  { %1485 = vsyncpa [#allocation6], 1 }
 0x4af   :  { %1487 = vsyncpa [#allocation6 + $0x1], 1 }

</bundles_post_ra>
